<compile_context>
chip_gen: v7x
topology: tpu7x:2x2x1
jax: 0.10.0
libtpu: 0.0.40
codegen_flags: <defaults>
</compile_context>

<pallas_src>
import functools
import math

import jax
import jax.numpy as jnp
from jax import lax
from jax.experimental import pallas as pl
from jax.experimental.pallas import tpu as pltpu


# ---------------------------------------------------------------------------
# Kernel 1: tiled linear   y = x @ W^T + b      (the nn.Linear(1024, 1024))
# ---------------------------------------------------------------------------
def _linear_kernel(x_ref, w_ref, b_ref, o_ref, acc_ref, *, mxu_dtype):
    k = pl.program_id(2)

    @pl.when(k == 0)
    def _():
        acc_ref[...] = jnp.zeros_like(acc_ref)

    acc_ref[...] += jnp.dot(
        x_ref[...].astype(mxu_dtype),
        w_ref[...].astype(mxu_dtype),
        preferred_element_type=jnp.float32,
    )

    @pl.when(k == pl.num_programs(2) - 1)
    def _():
        # fused bias epilogue
        o_ref[...] = (acc_ref[...] + b_ref[...]).astype(o_ref.dtype)


def linear_pallas(x, wt, b, *, tm=128, tn=256, tk=256, mxu_dtype=jnp.float32):
    m, kdim = x.shape
    _, n = wt.shape
    tm, tn, tk = min(tm, m), min(tn, n), min(tk, kdim)
    assert m % tm == 0 and n % tn == 0 and kdim % tk == 0, "shapes must tile evenly"
    grid = (m // tm, n // tn, kdim // tk)
    return pl.pallas_call(
        functools.partial(_linear_kernel, mxu_dtype=mxu_dtype),
        out_shape=jax.ShapeDtypeStruct((m, n), jnp.float32),
        grid_spec=pltpu.PrefetchScalarGridSpec(
            num_scalar_prefetch=0,
            grid=grid,
            in_specs=[
                pl.BlockSpec((tm, tk), lambda i, j, k: (i, k)),
                pl.BlockSpec((tk, tn), lambda i, j, k: (k, j)),
                pl.BlockSpec((1, tn), lambda i, j, k: (0, j)),
            ],
            out_specs=pl.BlockSpec((tm, tn), lambda i, j, k: (i, j)),
            scratch_shapes=[pltpu.VMEM((tm, tn), jnp.float32)],
        ),
        compiler_params=pltpu.CompilerParams(
            dimension_semantics=("parallel", "parallel", "arbitrary"),
            vmem_limit_bytes=32 * 1024 * 1024,
        ),
    )(x, wt, b)


# ---------------------------------------------------------------------------
# Kernel 2: scores = sigmoid( f @ term^T )      (torch.mm(..., h['term'].t()))
# ---------------------------------------------------------------------------
def _score_kernel(f_ref, t_ref, o_ref, acc_ref, *, mxu_dtype):
    k = pl.program_id(2)

    @pl.when(k == 0)
    def _():
        acc_ref[...] = jnp.zeros_like(acc_ref)

    # contract the feature dim of both operands: (tm, tk) x (tn, tk) -> (tm, tn)
    acc_ref[...] += lax.dot_general(
        f_ref[...].astype(mxu_dtype),
        t_ref[...].astype(mxu_dtype),
        (((1,), (1,)), ((), ())),
        preferred_element_type=jnp.float32,
    )

    @pl.when(k == pl.num_programs(2) - 1)
    def _():
        # fused sigmoid epilogue (EUP path; output stays lane-dense)
        o_ref[...] = jax.nn.sigmoid(acc_ref[...]).astype(o_ref.dtype)


def score_sigmoid_pallas(f, term, *, tm=128, tn=128, tk=256, mxu_dtype=jnp.float32):
    m, kdim = f.shape
    n, kdim2 = term.shape
    assert kdim == kdim2
    tm, tn, tk = min(tm, m), min(tn, n), min(tk, kdim)
    assert m % tm == 0 and n % tn == 0 and kdim % tk == 0, "shapes must tile evenly"
    grid = (m // tm, n // tn, kdim // tk)
    return pl.pallas_call(
        functools.partial(_score_kernel, mxu_dtype=mxu_dtype),
        out_shape=jax.ShapeDtypeStruct((m, n), jnp.float32),
        grid_spec=pltpu.PrefetchScalarGridSpec(
            num_scalar_prefetch=0,
            grid=grid,
            in_specs=[
                pl.BlockSpec((tm, tk), lambda i, j, k: (i, k)),
                pl.BlockSpec((tn, tk), lambda i, j, k: (j, k)),
            ],
            out_specs=pl.BlockSpec((tm, tn), lambda i, j, k: (i, j)),
            scratch_shapes=[pltpu.VMEM((tm, tn), jnp.float32)],
        ),
        compiler_params=pltpu.CompilerParams(
            dimension_semantics=("parallel", "parallel", "arbitrary"),
            vmem_limit_bytes=32 * 1024 * 1024,
        ),
    )(f, term)


# ---------------------------------------------------------------------------
# Module forward:  sigmoid( (h_protein @ W^T + b) @ h_term^T )
# ---------------------------------------------------------------------------
def hetero_dot_product_predictor(h_protein, h_term, wt, b, *, mxu_dtype=jnp.float32):
    f = linear_pallas(h_protein, wt, b, mxu_dtype=mxu_dtype)
    return score_sigmoid_pallas(f, h_term, mxu_dtype=mxu_dtype)


# ----------------------------------- main ------------------------------------
if __name__ == "__main__":
    key = jax.random.PRNGKey(0)
    D = 1024                      # fixed by nn.Linear(1024, 1024)
    Np, Nt = 256, 256             # small protein / term node counts

    k_w, k_b, k_p, k_t = jax.random.split(key, 4)

    # nn.Linear default init; weight stored pre-transposed as (in, out) = W^T.
    bound = 1.0 / math.sqrt(D)
    wt = jax.random.uniform(k_w, (D, D), jnp.float32, -bound, bound)
    b = jax.random.uniform(k_b, (1, D), jnp.float32, -bound, bound)

    h_protein = jax.random.normal(k_p, (Np, D), jnp.float32)
    h_term = jax.random.normal(k_t, (Nt, D), jnp.float32)

    predict = jax.jit(hetero_dot_product_predictor)
    out = jax.block_until_ready(predict(h_protein, h_term, wt, b))
    assert out.shape == (Np, Nt)

    # pure-JAX reference (highest precision so the reference itself is not the
    # noisy side of the comparison)
    f_ref = jnp.dot(h_protein, wt, precision=lax.Precision.HIGHEST) + b
    ref = jax.nn.sigmoid(
        jnp.dot(f_ref, h_term.T, precision=lax.Precision.HIGHEST))
    max_err = float(jnp.max(jnp.abs(out - ref)))
    assert max_err < 5e-3, f"max abs error {max_err}"

    print("KERNEL_OK")
</pallas_src>

<mosaic_0001>
module attributes {stable_mosaic.version = 11 : i64} {
  func.func @_linear_kernel(%arg0: i32, %arg1: i32, %arg2: i32, %arg3: memref<128x256xf32, #tpu.memory_space<vmem>>, %arg4: memref<256x256xf32, #tpu.memory_space<vmem>>, %arg5: memref<1x256xf32, #tpu.memory_space<vmem>>, %arg6: memref<128x256xf32, #tpu.memory_space<vmem>>, %arg7: memref<128x256xf32, #tpu.memory_space<vmem>>) attributes {dimension_semantics = [#tpu.dimension_semantics<parallel>, #tpu.dimension_semantics<parallel>, #tpu.dimension_semantics<arbitrary>], iteration_bounds = array<i64: 2, 4, 4>, scalar_prefetch = 0 : i64, scratch_operands = 1 : i64, tpu.core_type = #tpu.core_type<tc>, window_params = [{transform_indices = @transform_0, window_bounds = array<i64: 128, 256>}, {transform_indices = @transform_1, window_bounds = array<i64: 256, 256>}, {transform_indices = @transform_2, window_bounds = array<i64: 1, 256>}, {transform_indices = @transform_3, window_bounds = array<i64: 128, 256>}]} {
    %c0_i32 = arith.constant 0 : i32
    %0 = arith.cmpi eq, %arg2, %c0_i32 : i32
    %1 = arith.extui %0 : i1 to i32
    %c0_i32_0 = arith.constant 0 : i32
    %2 = arith.cmpi ne, %1, %c0_i32_0 : i32
    scf.if %2 {
      %cst_9 = arith.constant 0.000000e+00 : f32
      %12 = vector.broadcast %cst_9 : f32 to vector<128x256xf32>
      %c0_10 = arith.constant 0 : index
      %c0_11 = arith.constant 0 : index
      %13 = vector.load %arg7[%c0_10, %c0_11] : memref<128x256xf32, #tpu.memory_space<vmem>>, vector<128x256xf32>
      tpu.vector_store %arg7[%c0_10, %c0_11], %12 {strides = array<i32>} : memref<128x256xf32, #tpu.memory_space<vmem>>, vector<128x256xf32>,
    } else {
    }
    %c0 = arith.constant 0 : index
    %c0_1 = arith.constant 0 : index
    %3 = vector.load %arg7[%c0, %c0_1] : memref<128x256xf32, #tpu.memory_space<vmem>>, vector<128x256xf32>
    %c0_2 = arith.constant 0 : index
    %c0_3 = arith.constant 0 : index
    %4 = vector.load %arg3[%c0_2, %c0_3] : memref<128x256xf32, #tpu.memory_space<vmem>>, vector<128x256xf32>
    %c0_4 = arith.constant 0 : index
    %c0_5 = arith.constant 0 : index
    %5 = vector.load %arg4[%c0_4, %c0_5] : memref<256x256xf32, #tpu.memory_space<vmem>>, vector<256x256xf32>
    %cst = arith.constant dense<0.000000e+00> : vector<128x256xf32>
    %6 = tpu.matmul %4, %5, %cst {dimension_numbers = #tpu.dot_dimension_numbers<[1], [0], [0], [1], [0, 0, 1, 1], [], []>} : vector<128x256xf32>, vector<256x256xf32>, vector<128x256xf32> -> vector<128x256xf32>
    %7 = arith.addf %3, %6 : vector<128x256xf32>
    %c0_6 = arith.constant 0 : index
    %c0_7 = arith.constant 0 : index
    %8 = vector.load %arg7[%c0_6, %c0_7] : memref<128x256xf32, #tpu.memory_space<vmem>>, vector<128x256xf32>
    tpu.vector_store %arg7[%c0_6, %c0_7], %7 {strides = array<i32>} : memref<128x256xf32, #tpu.memory_space<vmem>>, vector<128x256xf32>,
    %c3_i32 = arith.constant 3 : i32
    %9 = arith.cmpi eq, %arg2, %c3_i32 : i32
    %10 = arith.extui %9 : i1 to i32
    %c0_i32_8 = arith.constant 0 : i32
    %11 = arith.cmpi ne, %10, %c0_i32_8 : i32
    scf.if %11 {
      %c0_9 = arith.constant 0 : index
      %c0_10 = arith.constant 0 : index
      %12 = vector.load %arg7[%c0_9, %c0_10] : memref<128x256xf32, #tpu.memory_space<vmem>>, vector<128x256xf32>
      %c0_11 = arith.constant 0 : index
      %c0_12 = arith.constant 0 : index
      %13 = vector.load %arg5[%c0_11, %c0_12] : memref<1x256xf32, #tpu.memory_space<vmem>>, vector<1x256xf32>
      %14 = vector.broadcast %13 : vector<1x256xf32> to vector<128x256xf32>
      %15 = arith.addf %12, %14 : vector<128x256xf32>
      %c0_13 = arith.constant 0 : index
      %c0_14 = arith.constant 0 : index
      %16 = vector.load %arg6[%c0_13, %c0_14] : memref<128x256xf32, #tpu.memory_space<vmem>>, vector<128x256xf32>
      tpu.vector_store %arg6[%c0_13, %c0_14], %15 {strides = array<i32>} : memref<128x256xf32, #tpu.memory_space<vmem>>, vector<128x256xf32>,
    } else {
    }
    return
  }
  func.func @transform_0(%arg0: i32, %arg1: i32, %arg2: i32) -> (i32, i32) {
    %c0_i32 = arith.constant 0 : i32
    return %arg0, %arg2 : i32, i32
  }
  func.func @transform_1(%arg0: i32, %arg1: i32, %arg2: i32) -> (i32, i32) {
    %c0_i32 = arith.constant 0 : i32
    return %arg2, %arg1 : i32, i32
  }
  func.func @transform_2(%arg0: i32, %arg1: i32, %arg2: i32) -> (i32, i32) {
    %c0_i32 = arith.constant 0 : i32
    %c0_i32_0 = arith.constant 0 : i32
    return %c0_i32, %arg1 : i32, i32
  }
  func.func @transform_3(%arg0: i32, %arg1: i32, %arg2: i32) -> (i32, i32) {
    %c0_i32 = arith.constant 0 : i32
    return %arg0, %arg1 : i32, i32
  }
}

module attributes {stable_mosaic.version = 11 : i64} {
  func.func @_score_kernel(%arg0: i32, %arg1: i32, %arg2: i32, %arg3: memref<128x256xf32, #tpu.memory_space<vmem>>, %arg4: memref<128x256xf32, #tpu.memory_space<vmem>>, %arg5: memref<128x128xf32, #tpu.memory_space<vmem>>, %arg6: memref<128x128xf32, #tpu.memory_space<vmem>>) attributes {dimension_semantics = [#tpu.dimension_semantics<parallel>, #tpu.dimension_semantics<parallel>, #tpu.dimension_semantics<arbitrary>], iteration_bounds = array<i64: 2, 2, 4>, scalar_prefetch = 0 : i64, scratch_operands = 1 : i64, tpu.core_type = #tpu.core_type<tc>, window_params = [{transform_indices = @transform_0, window_bounds = array<i64: 128, 256>}, {transform_indices = @transform_1, window_bounds = array<i64: 128, 256>}, {transform_indices = @transform_2, window_bounds = array<i64: 128, 128>}]} {
    %c0_i32 = arith.constant 0 : i32
    %0 = arith.cmpi eq, %arg2, %c0_i32 : i32
    %1 = arith.extui %0 : i1 to i32
    %c0_i32_0 = arith.constant 0 : i32
    %2 = arith.cmpi ne, %1, %c0_i32_0 : i32
    scf.if %2 {
      %cst_9 = arith.constant 0.000000e+00 : f32
      %12 = vector.broadcast %cst_9 : f32 to vector<128x128xf32>
      %c0_10 = arith.constant 0 : index
      %c0_11 = arith.constant 0 : index
      %13 = vector.load %arg6[%c0_10, %c0_11] : memref<128x128xf32, #tpu.memory_space<vmem>>, vector<128x128xf32>
      tpu.vector_store %arg6[%c0_10, %c0_11], %12 {strides = array<i32>} : memref<128x128xf32, #tpu.memory_space<vmem>>, vector<128x128xf32>,
    } else {
    }
    %c0 = arith.constant 0 : index
    %c0_1 = arith.constant 0 : index
    %3 = vector.load %arg6[%c0, %c0_1] : memref<128x128xf32, #tpu.memory_space<vmem>>, vector<128x128xf32>
    %c0_2 = arith.constant 0 : index
    %c0_3 = arith.constant 0 : index
    %4 = vector.load %arg3[%c0_2, %c0_3] : memref<128x256xf32, #tpu.memory_space<vmem>>, vector<128x256xf32>
    %c0_4 = arith.constant 0 : index
    %c0_5 = arith.constant 0 : index
    %5 = vector.load %arg4[%c0_4, %c0_5] : memref<128x256xf32, #tpu.memory_space<vmem>>, vector<128x256xf32>
    %cst = arith.constant dense<0.000000e+00> : vector<128x128xf32>
    %6 = tpu.matmul %4, %5, %cst {dimension_numbers = #tpu.dot_dimension_numbers<[1], [1], [0], [0], [0, 0, 1, 0], [], []>} : vector<128x256xf32>, vector<128x256xf32>, vector<128x128xf32> -> vector<128x128xf32>
    %7 = arith.addf %3, %6 : vector<128x128xf32>
    %c0_6 = arith.constant 0 : index
    %c0_7 = arith.constant 0 : index
    %8 = vector.load %arg6[%c0_6, %c0_7] : memref<128x128xf32, #tpu.memory_space<vmem>>, vector<128x128xf32>
    tpu.vector_store %arg6[%c0_6, %c0_7], %7 {strides = array<i32>} : memref<128x128xf32, #tpu.memory_space<vmem>>, vector<128x128xf32>,
    %c3_i32 = arith.constant 3 : i32
    %9 = arith.cmpi eq, %arg2, %c3_i32 : i32
    %10 = arith.extui %9 : i1 to i32
    %c0_i32_8 = arith.constant 0 : i32
    %11 = arith.cmpi ne, %10, %c0_i32_8 : i32
    scf.if %11 {
      %c0_9 = arith.constant 0 : index
      %c0_10 = arith.constant 0 : index
      %12 = vector.load %arg6[%c0_9, %c0_10] : memref<128x128xf32, #tpu.memory_space<vmem>>, vector<128x128xf32>
      %13 = arith.negf %12 : vector<128x128xf32>
      %14 = math.exp %13 : vector<128x128xf32>
      %cst_11 = arith.constant 1.000000e+00 : f32
      %15 = vector.broadcast %cst_11 : f32 to vector<128x128xf32>
      %16 = arith.addf %15, %14 : vector<128x128xf32>
      %17 = arith.divf %15, %16 : vector<128x128xf32>
      %c0_12 = arith.constant 0 : index
      %c0_13 = arith.constant 0 : index
      %18 = vector.load %arg5[%c0_12, %c0_13] : memref<128x128xf32, #tpu.memory_space<vmem>>, vector<128x128xf32>
      tpu.vector_store %arg5[%c0_12, %c0_13], %17 {strides = array<i32>} : memref<128x128xf32, #tpu.memory_space<vmem>>, vector<128x128xf32>,
    } else {
    }
    return
  }
  func.func @transform_0(%arg0: i32, %arg1: i32, %arg2: i32) -> (i32, i32) {
    %c0_i32 = arith.constant 0 : i32
    return %arg0, %arg2 : i32, i32
  }
  func.func @transform_1(%arg0: i32, %arg1: i32, %arg2: i32) -> (i32, i32) {
    %c0_i32 = arith.constant 0 : i32
    return %arg1, %arg2 : i32, i32
  }
  func.func @transform_2(%arg0: i32, %arg1: i32, %arg2: i32) -> (i32, i32) {
    %c0_i32 = arith.constant 0 : i32
    return %arg0, %arg1 : i32, i32
  }
}

</mosaic_0001>

<bundles_post_ra>
// kernel: hetero_dot_product_predictor.3
= control target key start
LH: loop header
LB: loop body
LE: loop exit
PB: predicated region body
PF: predicated region fallthrough
CT: control target
= control target key end

     0   :  { %s1808_s0 = inlined_call_operand.vmem [shape: f32[256,1024], index: 0, kind: input, shape index: {}]   ;;  %s1809_s1 = inlined_call_operand.vmem [shape: f32[256,1024], index: 1, kind: input, shape index: {}]   ;;  %s1810_s2 = inlined_call_operand.hbm [shape: f32[256,256], index: 2, kind: output, shape index: {}]  }
   0x1   :  { %1814 = sst [smem:[#allocation12_spill]] %s1808_s0 }
   0x2   :  { %1815 = sst [smem:[#allocation13_spill]] %s1810_s2 }
   0x3   :  { %7 = vsyncpa [#allocation6], 0 }
   0x4   :  { %9 = vsyncpa [#allocation6 + $0x1], 0  ;;  %s1342_s9 = smov 0   ;;  %s1344_s10 = smov 0  }
   0x5   :  { %s1346_s11 = smov 0   ;;  %s1348_s12 = smov 0  }
   0x6   :  { %s1350_s13 = smov 0   ;;  %s1352_s14 = smov 0  }
   0x7   :  { %s1354_s15 = smov 0   ;;  %s1356_s16 = smov 0  }
   0x8   :  { %s1358_s17 = smov 0   ;;  %s1360_s18 = smov 0  }
   0x9   :  { %s1362_s19 = smov 0   ;;  %s1364_s20 = smov 0  }
   0xa   :  { %s1366_s21 = smov 0   ;;  %s1368_s22 = smov 0  }
   0xb LB: > { %1816 = sst [smem:[#allocation8_spill]] %s1300_s17  ;;  %s27_s25 = sadd.s32 1, %s1308_s19  ;;  %s1320_s22 = sphi %s1368_s22, %s15_s22   ;;  %s1316_s21 = sphi %s1366_s21, %s1845_s21   ;;  %s1312_s20 = sphi %s1364_s20, %s1844_s20   ;;  %s1308_s19 = sphi %s1362_s19, %s1843_s19   ;;  %s1304_s18 = sphi %s1360_s18, %s1842_s18   ;;  %s1300_s17 = sphi %s1358_s17, %s1841_s17   ;;  %s1296_s16 = sphi %s1356_s16, %s1840_s16   ;;  %s1292_s15 = sphi %s1354_s15, %s1839_s15   ;;  %s1288_s14 = sphi %s1352_s14, %s1838_s14   ;;  %s1284_s13 = sphi %s1350_s13, %s1837_s13   ;;  %s1280_s12 = sphi %s1348_s12, %s1836_s12   ;;  %s1276_s11 = sphi %s1346_s11, %s1835_s11   ;;  %s1272_s10 = sphi %s1344_s10, %s1834_s10   ;;  %s1268_s9 = sphi %s1342_s9, %s1833_s9  }
   0xc   : > { %1817 = sst [smem:[#allocation9_spill]] %s1304_s18  ;;  %s30_s26 = sadd.s32 1, %s1312_s20 }
   0xd   : > { %p28_p0 = scmp.ge.s32.totalorder %s27_s25, 4  ;;  %s34_s27 = sadd.s32 1, %s1316_s21 }
   0xe   : > { %s43_s28 = sadd.s32 1, %s1292_s15  ;;  %p50_p1 = scmp.ne.s32.totalorder %s1292_s15, %s1288_s14 }
   0xf   : > { %s1847_s25 = smov (%p28_p0, %s27_s25), 0  ;;  %s1849_s26 = smov (!%p28_p0, %s30_s26), %s1312_s20 }
  0x10   : > { %1818 = sst [smem:[#allocation10_spill]] %s1847_s25  ;;  %s39_s29 = ssub.s32 %s1308_s19, %s1847_s25 }
  0x11   : > { %p51_p2 = scmp.eq.s32.totalorder %s1320_s22, 0  ;;  %p32_p3 = scmp.ge.s32.totalorder %s1849_s26, 2 }
  0x12   : > { %s71_s30 = sadd.s32 1, %s1284_s13  ;;  %p78_p5 = scmp.ne.s32.totalorder %s1284_s13, %s1280_s12 }
  0x13   : > { %p1427_p4 = por %p51_p2, %p50_p1  ;;  %s1851_s26 = smov (%p32_p3, %s1849_s26), 0 }
  0x14   : > { %1820 = sst [smem:[#allocation11_spill]] %s1851_s26  ;;  %s1853_s27 = smov (!%p32_p3, %s34_s27), %s1316_s21 }
  0x15   : > { %s66_s4 = ssub.s32 %s1312_s20, %s1851_s26  ;;  %p1438_p6 = por %p78_p5, %p51_p2 }
  0x16   : > { %p36_p7 = scmp.ge.s32.totalorder %s1853_s27, 2  ;;  %s68_s6 = sor.u32 %s66_s4, %s39_s29 }
  0x17   : > { %p69_p8 = scmp.eq.s32.totalorder %s68_s6, 0  ;;  %s99_s7 = sadd.s32 1, %s1276_s11 }
  0x18   : > { %s1855_s27 = smov (%p36_p7, %s1853_s27), 0  ;;  %p109_p9 = scmp.ne.s32.totalorder %s1276_s11, %s1272_s10 }
  0x19   : > { %s1446_s8 = scalar_select %p69_p8, %s1284_s13, %s71_s30  }
  0x1a   : > { %s38_s24 = ssub.s32 %s1316_s21, %s1855_s27  ;;  %s1822_s25 = sadd.s32 4294967295, %s1320_s22  }
  0x1b   : > { %s40_s23 = sor.u32 %s39_s29, %s38_s24  ;;  %s96_s26 = sor.u32 %s66_s4, %s38_s24 }
  0x1c   : > { %p41_p10 = scmp.eq.s32.totalorder %s40_s23, 0  ;;  %p97_p11 = scmp.eq.s32.totalorder %s96_s26, 0 }
  0x1d   : > { %p110_p12 = scmp.eq.s32.totalorder %s1822_s25, 15  ;;  %p115_p13 = scmp.ne.s32.totalorder %s1272_s10, %s1268_s9 }
  0x1e   : > { %s1457_s2 = scalar_select %p41_p10, %s1292_s15, %s43_s28  }
  0x1f   : > { %s1460_s17 = scalar_select %p97_p11, %s1276_s11, %s99_s7  }
  0x20   : > { %p1462_p0 = por %p110_p12, %p109_p9  ;;  %s1824_s18 = sadd.s32 4294967294, %s1320_s22  }
  0x21   : > { %p116_p1 = scmp.eq.s32.totalorder %s1824_s18, 15  ;;  %p901_p3 = scmp.ge.s32.totalorder %s1320_s22, 16 }
  0x23   : > { %p1468_p2 = por %p116_p1, %p115_p13  ;;  %132 = sbr.rel (%p901_p3) target bundleno = 91 (0x5b), region = 16 }
  0x2a   : > { %135 = sbr.rel (!%p1427_p4) target bundleno = 68 (0x44), region = 20  ;;  %s137_s23 = sand.u32 (%p1427_p4), 1, %s1292_s15  }
  0x2b   : > { %s904_s24 = sshll.u32 (%p1427_p4), %s1308_s19, 1  ;;  %s902_s25 = sshll.u32 (%p1427_p4), %s137_s23, 8 }
  0x2c   : > { %s940_s26 = sshll.u32 (%p1427_p4), %s1316_s21, 7  ;;  %s1826_s0 = sld [smem:[#allocation12_spill]] (%p1427_p4) }
  0x2d   : > { %s143_s28 = sadd.s32 (%p1427_p4), %s940_s26, %s904_s24  ;;  %s1486_s3 = scalar_lea.vmem (%p1427_p4), [#allocation3], %s902_s25 }
  0x2e   : > { %s906_s29 = sshll.u32 (%p1427_p4), %s143_s28, 3 }
  0x32   : > { %s1481_s7 = scalar_lea.vmem %s1826_s0, %s906_s29 }
  0x33   : > { %v158_v0 = vld [vmem:[%s1481_s7] sm:$0xff]  ;;  %v160_v1 = vld [vmem:[%s1481_s7 + $0x8] sm:$0xff] }
  0x34   : > { %v162_v2 = vld [vmem:[%s1481_s7 + $0x40] sm:$0xff]  ;;  %159 = vst [vmem:[%s1486_s3] sm:$0xff] %v158_v0  ;;  %161 = vst [vmem:[%s1486_s3 + $0x8] sm:$0xff] %v160_v1  ;;  %v164_v3 = vld [vmem:[%s1481_s7 + $0x48] sm:$0xff] }
  0x35   : > { %163 = vst [vmem:[%s1486_s3 + $0x10] sm:$0xff] %v162_v2  ;;  %v166_v4 = vld [vmem:[%s1481_s7 + $0x80] sm:$0xff]  ;;  %v168_v5 = vld [vmem:[%s1481_s7 + $0x88] sm:$0xff]  ;;  %165 = vst [vmem:[%s1486_s3 + $0x18] sm:$0xff] %v164_v3 }
  0x36   : > { %167 = vst [vmem:[%s1486_s3 + $0x20] sm:$0xff] %v166_v4  ;;  %169 = vst [vmem:[%s1486_s3 + $0x28] sm:$0xff] %v168_v5  ;;  %v170_v6 = vld [vmem:[%s1481_s7 + $0xc0] sm:$0xff]  ;;  %v172_v7 = vld [vmem:[%s1481_s7 + $0xc8] sm:$0xff] }
  0x37   : > { %v174_v8 = vld [vmem:[%s1481_s7 + $0x100] sm:$0xff]  ;;  %171 = vst [vmem:[%s1486_s3 + $0x30] sm:$0xff] %v170_v6  ;;  %173 = vst [vmem:[%s1486_s3 + $0x38] sm:$0xff] %v172_v7  ;;  %v176_v9 = vld [vmem:[%s1481_s7 + $0x108] sm:$0xff] }
  0x38   : > { %175 = vst [vmem:[%s1486_s3 + $0x40] sm:$0xff] %v174_v8  ;;  %v178_v10 = vld [vmem:[%s1481_s7 + $0x140] sm:$0xff]  ;;  %v180_v11 = vld [vmem:[%s1481_s7 + $0x148] sm:$0xff]  ;;  %177 = vst [vmem:[%s1486_s3 + $0x48] sm:$0xff] %v176_v9 }
  0x39   : > { %179 = vst [vmem:[%s1486_s3 + $0x50] sm:$0xff] %v178_v10  ;;  %181 = vst [vmem:[%s1486_s3 + $0x58] sm:$0xff] %v180_v11  ;;  %v182_v12 = vld [vmem:[%s1481_s7 + $0x180] sm:$0xff]  ;;  %v184_v13 = vld [vmem:[%s1481_s7 + $0x188] sm:$0xff] }
  0x3a   : > { %v186_v14 = vld [vmem:[%s1481_s7 + $0x1c0] sm:$0xff]  ;;  %183 = vst [vmem:[%s1486_s3 + $0x60] sm:$0xff] %v182_v12  ;;  %185 = vst [vmem:[%s1486_s3 + $0x68] sm:$0xff] %v184_v13  ;;  %v188_v15 = vld [vmem:[%s1481_s7 + $0x1c8] sm:$0xff] }
  0x3b   : > { %187 = vst [vmem:[%s1486_s3 + $0x70] sm:$0xff] %v186_v14  ;;  %v190_v16 = vld [vmem:[%s1481_s7 + $0x200] sm:$0xff]  ;;  %v192_v17 = vld [vmem:[%s1481_s7 + $0x208] sm:$0xff]  ;;  %189 = vst [vmem:[%s1486_s3 + $0x78] sm:$0xff] %v188_v15 }
  0x3c   : > { %191 = vst [vmem:[%s1486_s3 + $0x80] sm:$0xff] %v190_v16  ;;  %193 = vst [vmem:[%s1486_s3 + $0x88] sm:$0xff] %v192_v17  ;;  %v194_v18 = vld [vmem:[%s1481_s7 + $0x240] sm:$0xff]  ;;  %v196_v19 = vld [vmem:[%s1481_s7 + $0x248] sm:$0xff] }
  0x3d   : > { %v198_v20 = vld [vmem:[%s1481_s7 + $0x280] sm:$0xff]  ;;  %195 = vst [vmem:[%s1486_s3 + $0x90] sm:$0xff] %v194_v18  ;;  %197 = vst [vmem:[%s1486_s3 + $0x98] sm:$0xff] %v196_v19  ;;  %v200_v21 = vld [vmem:[%s1481_s7 + $0x288] sm:$0xff] }
  0x3e   : > { %199 = vst [vmem:[%s1486_s3 + $0xa0] sm:$0xff] %v198_v20  ;;  %v202_v22 = vld [vmem:[%s1481_s7 + $0x2c0] sm:$0xff]  ;;  %v204_v23 = vld [vmem:[%s1481_s7 + $0x2c8] sm:$0xff]  ;;  %201 = vst [vmem:[%s1486_s3 + $0xa8] sm:$0xff] %v200_v21 }
  0x3f   : > { %203 = vst [vmem:[%s1486_s3 + $0xb0] sm:$0xff] %v202_v22  ;;  %205 = vst [vmem:[%s1486_s3 + $0xb8] sm:$0xff] %v204_v23  ;;  %v206_v24 = vld [vmem:[%s1481_s7 + $0x300] sm:$0xff]  ;;  %v208_v25 = vld [vmem:[%s1481_s7 + $0x308] sm:$0xff] }
  0x40   : > { %v210_v26 = vld [vmem:[%s1481_s7 + $0x340] sm:$0xff]  ;;  %207 = vst [vmem:[%s1486_s3 + $0xc0] sm:$0xff] %v206_v24  ;;  %209 = vst [vmem:[%s1486_s3 + $0xc8] sm:$0xff] %v208_v25  ;;  %v212_v27 = vld [vmem:[%s1481_s7 + $0x348] sm:$0xff] }
  0x41   : > { %211 = vst [vmem:[%s1486_s3 + $0xd0] sm:$0xff] %v210_v26  ;;  %v214_v28 = vld [vmem:[%s1481_s7 + $0x380] sm:$0xff]  ;;  %v216_v29 = vld [vmem:[%s1481_s7 + $0x388] sm:$0xff]  ;;  %213 = vst [vmem:[%s1486_s3 + $0xd8] sm:$0xff] %v212_v27 }
  0x42   : > { %215 = vst [vmem:[%s1486_s3 + $0xe0] sm:$0xff] %v214_v28  ;;  %217 = vst [vmem:[%s1486_s3 + $0xe8] sm:$0xff] %v216_v29  ;;  %v218_v30 = vld [vmem:[%s1481_s7 + $0x3c0] sm:$0xff]  ;;  %v220_v31 = vld [vmem:[%s1481_s7 + $0x3c8] sm:$0xff] }
  0x43   : > { %219 = vst [vmem:[%s1486_s3 + $0xf0] sm:$0xff] %v218_v30  ;;  %221 = vst [vmem:[%s1486_s3 + $0xf8] sm:$0xff] %v220_v31 }
  0x44 PF: > { %227 = sbr.rel (!%p1438_p6) target bundleno = 91 (0x5b), region = 43  ;;  %s229_s23 = sand.u32 (%p1438_p6), 1, %s1284_s13  }
  0x45   : > { %s909_s24 = sshll.u32 (%p1438_p6), %s1308_s19, 1  ;;  %s907_s25 = sshll.u32 (%p1438_p6), %s229_s23, 8 }
  0x46   : > { %s941_s26 = sshll.u32 (%p1438_p6), %s1312_s20, 7  ;;  %s1562_s5 = scalar_lea.vmem (%p1438_p6), [#allocation4], %s907_s25 }
  0x47   : > { %s235_s28 = sadd.s32 (%p1438_p6), %s941_s26, %s909_s24 }
  0x48   : > { %s911_s29 = sshll.u32 (%p1438_p6), %s235_s28, 3 }
  0x49   : > { %s1557_s0 = scalar_lea.vmem (%p1438_p6), %s1809_s1, %s911_s29 }
  0x4a   : > { %v250_v32 = vld [vmem:[%s1557_s0] sm:$0xff] (%p1438_p6)  ;;  %v252_v33 = vld [vmem:[%s1557_s0 + $0x8] sm:$0xff] (%p1438_p6) }
  0x4b   : > { %v254_v34 = vld [vmem:[%s1557_s0 + $0x40] sm:$0xff]  ;;  %251 = vst [vmem:[%s1562_s5] sm:$0xff] %v250_v32  ;;  %253 = vst [vmem:[%s1562_s5 + $0x8] sm:$0xff] %v252_v33  ;;  %v256_v35 = vld [vmem:[%s1557_s0 + $0x48] sm:$0xff] }
  0x4c   : > { %255 = vst [vmem:[%s1562_s5 + $0x10] sm:$0xff] %v254_v34  ;;  %v258_v36 = vld [vmem:[%s1557_s0 + $0x80] sm:$0xff]  ;;  %v260_v37 = vld [vmem:[%s1557_s0 + $0x88] sm:$0xff]  ;;  %257 = vst [vmem:[%s1562_s5 + $0x18] sm:$0xff] %v256_v35 }
  0x4d   : > { %259 = vst [vmem:[%s1562_s5 + $0x20] sm:$0xff] %v258_v36  ;;  %261 = vst [vmem:[%s1562_s5 + $0x28] sm:$0xff] %v260_v37  ;;  %v262_v38 = vld [vmem:[%s1557_s0 + $0xc0] sm:$0xff]  ;;  %v264_v39 = vld [vmem:[%s1557_s0 + $0xc8] sm:$0xff] }
  0x4e   : > { %v266_v40 = vld [vmem:[%s1557_s0 + $0x100] sm:$0xff]  ;;  %263 = vst [vmem:[%s1562_s5 + $0x30] sm:$0xff] %v262_v38  ;;  %265 = vst [vmem:[%s1562_s5 + $0x38] sm:$0xff] %v264_v39  ;;  %v268_v41 = vld [vmem:[%s1557_s0 + $0x108] sm:$0xff] }
  0x4f   : > { %267 = vst [vmem:[%s1562_s5 + $0x40] sm:$0xff] %v266_v40  ;;  %v270_v42 = vld [vmem:[%s1557_s0 + $0x140] sm:$0xff]  ;;  %v272_v43 = vld [vmem:[%s1557_s0 + $0x148] sm:$0xff]  ;;  %269 = vst [vmem:[%s1562_s5 + $0x48] sm:$0xff] %v268_v41 }
  0x50   : > { %271 = vst [vmem:[%s1562_s5 + $0x50] sm:$0xff] %v270_v42  ;;  %273 = vst [vmem:[%s1562_s5 + $0x58] sm:$0xff] %v272_v43  ;;  %v274_v44 = vld [vmem:[%s1557_s0 + $0x180] sm:$0xff]  ;;  %v276_v45 = vld [vmem:[%s1557_s0 + $0x188] sm:$0xff] }
  0x51   : > { %v278_v46 = vld [vmem:[%s1557_s0 + $0x1c0] sm:$0xff]  ;;  %275 = vst [vmem:[%s1562_s5 + $0x60] sm:$0xff] %v274_v44  ;;  %277 = vst [vmem:[%s1562_s5 + $0x68] sm:$0xff] %v276_v45  ;;  %v280_v47 = vld [vmem:[%s1557_s0 + $0x1c8] sm:$0xff] }
  0x52   : > { %279 = vst [vmem:[%s1562_s5 + $0x70] sm:$0xff] %v278_v46  ;;  %v282_v48 = vld [vmem:[%s1557_s0 + $0x200] sm:$0xff]  ;;  %v284_v49 = vld [vmem:[%s1557_s0 + $0x208] sm:$0xff]  ;;  %281 = vst [vmem:[%s1562_s5 + $0x78] sm:$0xff] %v280_v47 }
  0x53   : > { %283 = vst [vmem:[%s1562_s5 + $0x80] sm:$0xff] %v282_v48  ;;  %285 = vst [vmem:[%s1562_s5 + $0x88] sm:$0xff] %v284_v49  ;;  %v286_v50 = vld [vmem:[%s1557_s0 + $0x240] sm:$0xff]  ;;  %v288_v51 = vld [vmem:[%s1557_s0 + $0x248] sm:$0xff] }
  0x54   : > { %v290_v52 = vld [vmem:[%s1557_s0 + $0x280] sm:$0xff]  ;;  %287 = vst [vmem:[%s1562_s5 + $0x90] sm:$0xff] %v286_v50  ;;  %289 = vst [vmem:[%s1562_s5 + $0x98] sm:$0xff] %v288_v51  ;;  %v292_v53 = vld [vmem:[%s1557_s0 + $0x288] sm:$0xff] }
  0x55   : > { %291 = vst [vmem:[%s1562_s5 + $0xa0] sm:$0xff] %v290_v52  ;;  %v294_v54 = vld [vmem:[%s1557_s0 + $0x2c0] sm:$0xff]  ;;  %v296_v55 = vld [vmem:[%s1557_s0 + $0x2c8] sm:$0xff]  ;;  %293 = vst [vmem:[%s1562_s5 + $0xa8] sm:$0xff] %v292_v53 }
  0x56   : > { %295 = vst [vmem:[%s1562_s5 + $0xb0] sm:$0xff] %v294_v54  ;;  %297 = vst [vmem:[%s1562_s5 + $0xb8] sm:$0xff] %v296_v55  ;;  %v298_v56 = vld [vmem:[%s1557_s0 + $0x300] sm:$0xff]  ;;  %v300_v57 = vld [vmem:[%s1557_s0 + $0x308] sm:$0xff] }
  0x57   : > { %v302_v58 = vld [vmem:[%s1557_s0 + $0x340] sm:$0xff]  ;;  %299 = vst [vmem:[%s1562_s5 + $0xc0] sm:$0xff] %v298_v56  ;;  %301 = vst [vmem:[%s1562_s5 + $0xc8] sm:$0xff] %v300_v57  ;;  %v304_v59 = vld [vmem:[%s1557_s0 + $0x348] sm:$0xff] }
  0x58   : > { %303 = vst [vmem:[%s1562_s5 + $0xd0] sm:$0xff] %v302_v58  ;;  %v306_v60 = vld [vmem:[%s1557_s0 + $0x380] sm:$0xff]  ;;  %v308_v61 = vld [vmem:[%s1557_s0 + $0x388] sm:$0xff]  ;;  %305 = vst [vmem:[%s1562_s5 + $0xd8] sm:$0xff] %v304_v59 }
  0x59   : > { %307 = vst [vmem:[%s1562_s5 + $0xe0] sm:$0xff] %v306_v60  ;;  %309 = vst [vmem:[%s1562_s5 + $0xe8] sm:$0xff] %v308_v61  ;;  %v310_v62 = vld [vmem:[%s1557_s0 + $0x3c0] sm:$0xff]  ;;  %v312_v63 = vld [vmem:[%s1557_s0 + $0x3c8] sm:$0xff] }
  0x5a   : > { %311 = vst [vmem:[%s1562_s5 + $0xf0] sm:$0xff] %v310_v62  ;;  %313 = vst [vmem:[%s1562_s5 + $0xf8] sm:$0xff] %v312_v63 }
  0x5b PF: > { %p912_p4 = scmp.ge.s32.totalorder %s1320_s22, 1  ;;  %p318_p5 = scmp.lt.s32.totalorder %s1320_s22, 17 }
  0x5d   : > { %p319_p6 = pnand %p912_p4, %p318_p5 }
  0x5e   : > { %s325_s7 = sand.u32 (!%p319_p6), 1, %s1288_s14   ;;  %s332_s3 = sand.u32 (!%p319_p6), 1, %s1280_s12  }
  0x5f   : > { %322 = sbr.rel (%p319_p6) target bundleno = 505 (0x1f9), region = 66  ;;  %s913_s23 = sshll.u32 (!%p319_p6), %s325_s7, 8 }
  0x60   : > { %s914_s24 = sshll.u32 (!%p319_p6), %s332_s3, 8  ;;  %s354_s25 = sand.u32 (!%p319_p6), 1, %s1272_s10  }
  0x61   : > { %s915_s0 = sshll.u32 (!%p319_p6), %s354_s25, 7  ;;  %s1632_s26 = scalar_lea.vmem (!%p319_p6), [#allocation3], %s913_s23 }
  0x62   : > { %s1634_s28 = scalar_lea.vmem (!%p319_p6), [#allocation4], %s914_s24  ;;  %s1636_s29 = scalar_lea.vmem (!%p319_p6), [#allocation5], %s915_s0 }
  0x63   : > { %p916_p7 = scmp.ne.s32.totalorder (!%p319_p6), %s1296_s16, 0 }
  0x66   : > { %365 = sbr.rel (%p916_p7) target bundleno = 111 (0x6f), region = 78  ;;  %v1322_v0 = vmov (!%p916_p7), 0.0  }
  0x67   : > { %366 = vst [vmem:[#allocation2] sm:$0xff] (!%p916_p7), %v1322_v0  ;;  %367 = vst [vmem:[#allocation2 + $0x8] sm:$0xff] (!%p916_p7), %v1322_v0 }
  0x68   : > { %368 = vst [vmem:[#allocation2 + $0x10] sm:$0xff] (!%p916_p7), %v1322_v0  ;;  %369 = vst [vmem:[#allocation2 + $0x18] sm:$0xff] (!%p916_p7), %v1322_v0 }
  0x69   : > { %370 = vst [vmem:[#allocation2 + $0x20] sm:$0xff] (!%p916_p7), %v1322_v0  ;;  %371 = vst [vmem:[#allocation2 + $0x28] sm:$0xff] (!%p916_p7), %v1322_v0 }
  0x6a   : > { %372 = vst [vmem:[#allocation2 + $0x30] sm:$0xff] (!%p916_p7), %v1322_v0  ;;  %373 = vst [vmem:[#allocation2 + $0x38] sm:$0xff] (!%p916_p7), %v1322_v0 }
  0x6b   : > { %374 = vst [vmem:[#allocation2 + $0x40] sm:$0xff] (!%p916_p7), %v1322_v0  ;;  %375 = vst [vmem:[#allocation2 + $0x48] sm:$0xff] (!%p916_p7), %v1322_v0 }
  0x6c   : > { %376 = vst [vmem:[#allocation2 + $0x50] sm:$0xff] (!%p916_p7), %v1322_v0  ;;  %377 = vst [vmem:[#allocation2 + $0x58] sm:$0xff] (!%p916_p7), %v1322_v0 }
  0x6d   : > { %378 = vst [vmem:[#allocation2 + $0x60] sm:$0xff] %v1322_v0  ;;  %379 = vst [vmem:[#allocation2 + $0x68] sm:$0xff] %v1322_v0 }
  0x6e   : > { %380 = vst [vmem:[#allocation2 + $0x70] sm:$0xff] %v1322_v0  ;;  %381 = vst [vmem:[#allocation2 + $0x78] sm:$0xff] %v1322_v0 }
  0x6f PF: > { %v431_v1 = vld [vmem:[%s1634_s28 + $0x8] sm:$0xff]  ;;  %v433_v2 = vld [vmem:[%s1634_s28 + $0x18] sm:$0xff]  ;;  %v430_v3 = vld [vmem:[%s1634_s28] sm:$0xff]  ;;  %p917_p8 = scmp.ne.s32.totalorder %s1296_s16, 3 }
  0x70   : > { %v943_v4 = vpack.c.bf16 %v433_v2, %v431_v1  ;;  %v432_v5 = vld [vmem:[%s1634_s28 + $0x10] sm:$0xff]  ;;  %v435_v6 = vld [vmem:[%s1634_s28 + $0x28] sm:$0xff]  ;;  %v437_v7 = vld [vmem:[%s1634_s28 + $0x38] sm:$0xff] }
  0x71   : > { %v945_v8 = vpack.c.bf16 %v432_v5, %v430_v3  ;;  %v947_v9 = vpack.c.bf16 %v437_v7, %v435_v6  ;;  %v434_v10 = vld [vmem:[%s1634_s28 + $0x20] sm:$0xff]  ;;  %v436_v11 = vld [vmem:[%s1634_s28 + $0x30] sm:$0xff]  ;;  %v439_v12 = vld [vmem:[%s1634_s28 + $0x48] sm:$0xff] }
  0x72   : > { %944 = vmatprep.subr.bf16.mxu0 %v943_v4  ;;  %975 = vmatprep.subr.bf16.mxu1 %v943_v4  ;;  %v441_v13 = vld [vmem:[%s1634_s28 + $0x58] sm:$0xff]  ;;  %v949_v14 = vpack.c.bf16 %v436_v11, %v434_v10  ;;  %v399_v16 = vld [vmem:[%s1632_s26 + $0x8] sm:$0xff]  ;;  %v438_v18 = vld [vmem:[%s1634_s28 + $0x40] sm:$0xff] }
  0x73   : > { %946 = vmatpush1.bf16.xpose.msra.mxu0 %v945_v8  ;;  %983 = vmatpush1.bf16.xpose.msra.mxu1 %v945_v8  ;;  %v951_v15 = vpack.c.bf16 %v441_v13, %v439_v12  ;;  %v415_v17 = vld [vmem:[%s1632_s26 + $0x88] sm:$0xff]  ;;  %v440_v19 = vld [vmem:[%s1634_s28 + $0x50] sm:$0xff]  ;;  %v445_v21 = vld [vmem:[%s1634_s28 + $0x78] sm:$0xff] }
  0x74   : > { %948 = vmatprep.subr.bf16.mxu0 %v947_v9  ;;  %976 = vmatprep.subr.bf16.mxu1 %v947_v9  ;;  %v443_v20 = vld [vmem:[%s1634_s28 + $0x68] sm:$0xff]  ;;  %v953_v22 = vpack.c.bf16 %v440_v19, %v438_v18  ;;  %v442_v24 = vld [vmem:[%s1634_s28 + $0x60] sm:$0xff]  ;;  %v444_v25 = vld [vmem:[%s1634_s28 + $0x70] sm:$0xff] }
  0x75   : > { %526 = vmatprep.mubr.f32.mxu0 %v399_v16  ;;  %566 = vmatprep.mubr.f32.mxu1 %v415_v17  ;;  %v955_v23 = vpack.c.bf16 %v445_v21, %v443_v20  ;;  %v447_v26 = vld [vmem:[%s1634_s28 + $0x88] sm:$0xff]  ;;  %v449_v27 = vld [vmem:[%s1634_s28 + $0x98] sm:$0xff]  ;;  %v957_v28 = vpack.c.bf16 %v444_v25, %v442_v24  ;;  %v446_v30 = vld [vmem:[%s1634_s28 + $0x80] sm:$0xff] }
  0x76   : > { %v959_v29 = vpack.c.bf16 %v449_v27, %v447_v26  ;;  %v448_v31 = vld [vmem:[%s1634_s28 + $0x90] sm:$0xff]  ;;  %v451_v32 = vld [vmem:[%s1634_s28 + $0xa8] sm:$0xff]  ;;  %v453_v33 = vld [vmem:[%s1634_s28 + $0xb8] sm:$0xff] }
  0x77   : > { %v961_v34 = vpack.c.bf16 %v448_v31, %v446_v30  ;;  %v963_v35 = vpack.c.bf16 %v453_v33, %v451_v32  ;;  %v450_v36 = vld [vmem:[%s1634_s28 + $0xa0] sm:$0xff]  ;;  %v452_v37 = vld [vmem:[%s1634_s28 + $0xb0] sm:$0xff]  ;;  %v455_v38 = vld [vmem:[%s1634_s28 + $0xc8] sm:$0xff] }
  0x78   : > { %v457_v39 = vld [vmem:[%s1634_s28 + $0xd8] sm:$0xff]  ;;  %v965_v40 = vpack.c.bf16 %v452_v37, %v450_v36  ;;  %v454_v42 = vld [vmem:[%s1634_s28 + $0xc0] sm:$0xff]  ;;  %v456_v43 = vld [vmem:[%s1634_s28 + $0xd0] sm:$0xff] }
  0x79   : > { %v967_v41 = vpack.c.bf16 %v457_v39, %v455_v38  ;;  %v459_v44 = vld [vmem:[%s1634_s28 + $0xe8] sm:$0xff]  ;;  %v461_v45 = vld [vmem:[%s1634_s28 + $0xf8] sm:$0xff]  ;;  %v969_v46 = vpack.c.bf16 %v456_v43, %v454_v42  ;;  %v458_v48 = vld [vmem:[%s1634_s28 + $0xe0] sm:$0xff] }
  0x7a   : > { %v971_v47 = vpack.c.bf16 %v461_v45, %v459_v44  ;;  %v460_v49 = vld [vmem:[%s1634_s28 + $0xf0] sm:$0xff]  ;;  %v398_v51 = vld [vmem:[%s1632_s26] sm:$0xff]  ;;  %v401_v53 = vld [vmem:[%s1632_s26 + $0x18] sm:$0xff] }
  0x7b   : > { %950 = vmatpush1.bf16.xpose.msra.mxu0 %v949_v14  ;;  %984 = vmatpush1.bf16.xpose.msra.mxu1 %v949_v14  ;;  %v973_v50 = vpack.c.bf16 %v460_v49, %v458_v48  ;;  %v414_v52 = vld [vmem:[%s1632_s26 + $0x80] sm:$0xff]  ;;  %v417_v54 = vld [vmem:[%s1632_s26 + $0x98] sm:$0xff]  ;;  %v400_v55 = vld [vmem:[%s1632_s26 + $0x10] sm:$0xff] }
  0x7c   : > { %952 = vmatprep.subr.bf16.mxu0 %v951_v15  ;;  %977 = vmatprep.subr.bf16.mxu1 %v951_v15  ;;  %v416_v56 = vld [vmem:[%s1632_s26 + $0x90] sm:$0xff]  ;;  %v403_v57 = vld [vmem:[%s1632_s26 + $0x28] sm:$0xff]  ;;  %v402_v59 = vld [vmem:[%s1632_s26 + $0x20] sm:$0xff] }
  0x7d   : > { %v419_v58 = vld [vmem:[%s1632_s26 + $0xa8] sm:$0xff]  ;;  %v418_v60 = vld [vmem:[%s1632_s26 + $0xa0] sm:$0xff]  ;;  %v405_v61 = vld [vmem:[%s1632_s26 + $0x38] sm:$0xff] }
  0x7e   : > { %v421_v62 = vld [vmem:[%s1632_s26 + $0xb8] sm:$0xff]  ;;  %v404_v63 = vld [vmem:[%s1632_s26 + $0x30] sm:$0xff]  ;;  %v407_v1 = vld [vmem:[%s1632_s26 + $0x48] sm:$0xff] }
  0x7f   : > { %v420_v0 = vld [vmem:[%s1632_s26 + $0xb0] sm:$0xff]  ;;  %v423_v2 = vld [vmem:[%s1632_s26 + $0xc8] sm:$0xff]  ;;  %v406_v3 = vld [vmem:[%s1632_s26 + $0x40] sm:$0xff] }
  0x80   : > { %v422_v4 = vld [vmem:[%s1632_s26 + $0xc0] sm:$0xff]  ;;  %v409_v5 = vld [vmem:[%s1632_s26 + $0x58] sm:$0xff]  ;;  %v408_v7 = vld [vmem:[%s1632_s26 + $0x50] sm:$0xff] }
  0x81   : > { %v425_v6 = vld [vmem:[%s1632_s26 + $0xd8] sm:$0xff]  ;;  %v424_v8 = vld [vmem:[%s1632_s26 + $0xd0] sm:$0xff]  ;;  %v411_v9 = vld [vmem:[%s1632_s26 + $0x68] sm:$0xff] }
  0x82   : > { %v427_v10 = vld [vmem:[%s1632_s26 + $0xe8] sm:$0xff]  ;;  %v410_v11 = vld [vmem:[%s1632_s26 + $0x60] sm:$0xff]  ;;  %v413_v13 = vld [vmem:[%s1632_s26 + $0x78] sm:$0xff] }
  0x83   : > { %954 = vmatpush1.bf16.xpose.msra.mxu0 %v953_v22  ;;  %985 = vmatpush1.bf16.xpose.msra.mxu1 %v953_v22  ;;  %v426_v12 = vld [vmem:[%s1632_s26 + $0xe0] sm:$0xff]  ;;  %v429_v14 = vld [vmem:[%s1632_s26 + $0xf8] sm:$0xff]  ;;  %v412_v15 = vld [vmem:[%s1632_s26 + $0x70] sm:$0xff] }
  0x84   : > { %956 = vmatprep.subr.bf16.mxu0 %v955_v23  ;;  %978 = vmatprep.subr.bf16.mxu1 %v955_v23  ;;  %v428_v16 = vld [vmem:[%s1632_s26 + $0xf0] sm:$0xff]  ;;  %v382_v17 = vld [vmem:[#allocation2] sm:$0xff]  ;;  %v383_v25 = vld [vmem:[#allocation2 + $0x8] sm:$0xff] }
  0x85   : > { %v390_v18 = vld [vmem:[#allocation2 + $0x40] sm:$0xff]  ;;  %v391_v26 = vld [vmem:[#allocation2 + $0x48] sm:$0xff]  ;;  %v384_v33 = vld [vmem:[#allocation2 + $0x10] sm:$0xff] }
  0x86   : > { %v393_v42 = vld [vmem:[#allocation2 + $0x58] sm:$0xff]  ;;  %v386_v49 = vld [vmem:[#allocation2 + $0x20] sm:$0xff] }
  0x8b   : > { %958 = vmatpush1.bf16.xpose.msra.mxu0 %v957_v28  ;;  %986 = vmatpush1.bf16.xpose.msra.mxu1 %v957_v28 }
  0x8c   : > { %960 = vmatprep.subr.bf16.mxu0 %v959_v29  ;;  %979 = vmatprep.subr.bf16.mxu1 %v959_v29 }
  0x93   : > { %962 = vmatpush1.bf16.xpose.msra.mxu0 %v961_v34  ;;  %987 = vmatpush1.bf16.xpose.msra.mxu1 %v961_v34  ;;  %v392_v34 = vld [vmem:[#allocation2 + $0x50] sm:$0xff] }
  0x94   : > { %964 = vmatprep.subr.bf16.mxu0 %v963_v35  ;;  %980 = vmatprep.subr.bf16.mxu1 %v963_v35 }
  0x9b   : > { %966 = vmatpush1.bf16.xpose.msra.mxu0 %v965_v40  ;;  %988 = vmatpush1.bf16.xpose.msra.mxu1 %v965_v40 }
  0x9c   : > { %968 = vmatprep.subr.bf16.mxu0 %v967_v41  ;;  %981 = vmatprep.subr.bf16.mxu1 %v967_v41  ;;  %v385_v41 = vld [vmem:[#allocation2 + $0x18] sm:$0xff] }
  0xa3   : > { %970 = vmatpush1.bf16.xpose.msra.mxu0 %v969_v46  ;;  %989 = vmatpush1.bf16.xpose.msra.mxu1 %v969_v46 }
  0xa4   : > { %972 = vmatprep.subr.bf16.mxu0 %v971_v47  ;;  %982 = vmatprep.subr.bf16.mxu1 %v971_v47 }
  0xab   : > { %974 = vmatpush1.bf16.xpose.msra.mxu0 %v973_v50  ;;  %990 = vmatpush1.bf16.xpose.msra.mxu1 %v973_v50  ;;  %v394_v50 = vld [vmem:[#allocation2 + $0x60] sm:$0xff] }
  0xb2   : > { %527 = vmatmul.mubr.f32.vlgmr.msra.gmra.mrb[0].mxu0 %v398_v51  ;;  %567 = vmatmul.mubr.f32.vlgmr.msra.gmra.mrb[0].mxu1 %v414_v52 }
  0xb3   : > { %531 = vmatprep.mubr.f32.mxu0 %v401_v53  ;;  %571 = vmatprep.mubr.f32.mxu1 %v417_v54 }
  0xb6   : > { %532 = vmatmul.mubr.f32.gmra.mrb[2].mxu0 %v400_v55  ;;  %572 = vmatmul.mubr.f32.gmra.mrb[2].mxu1 %v416_v56 }
  0xb7   : > { %536 = vmatprep.mubr.f32.mxu0 %v403_v57  ;;  %576 = vmatprep.mubr.f32.mxu1 %v419_v58  ;;  %v387_v57 = vld [vmem:[#allocation2 + $0x28] sm:$0xff] }
  0xb8   : > { %v395_v58 = vld [vmem:[#allocation2 + $0x68] sm:$0xff] }
  0xba   : > { %537 = vmatmul.mubr.f32.gmra.mrb[4].mxu0 %v402_v59  ;;  %577 = vmatmul.mubr.f32.gmra.mrb[4].mxu1 %v418_v60 }
  0xbb   : > { %541 = vmatprep.mubr.f32.mxu0 %v405_v61  ;;  %581 = vmatprep.mubr.f32.mxu1 %v421_v62 }
  0xbe   : > { %542 = vmatmul.mubr.f32.gmra.mrb[6].mxu0 %v404_v63  ;;  %582 = vmatmul.mubr.f32.gmra.mrb[6].mxu1 %v420_v0 }
  0xbf   : > { %546 = vmatprep.mubr.f32.mxu0 %v407_v1  ;;  %586 = vmatprep.mubr.f32.mxu1 %v423_v2  ;;  %v388_v1 = vld [vmem:[#allocation2 + $0x30] sm:$0xff] }
  0xc0   : > { %v396_v2 = vld [vmem:[#allocation2 + $0x70] sm:$0xff] }
  0xc2   : > { %547 = vmatmul.mubr.f32.gmra.mrb[8].mxu0 %v406_v3  ;;  %587 = vmatmul.mubr.f32.gmra.mrb[8].mxu1 %v422_v4 }
  0xc3   : > { %551 = vmatprep.mubr.f32.mxu0 %v409_v5  ;;  %591 = vmatprep.mubr.f32.mxu1 %v425_v6 }
  0xc6   : > { %552 = vmatmul.mubr.f32.gmra.mrb[10].mxu0 %v408_v7  ;;  %592 = vmatmul.mubr.f32.gmra.mrb[10].mxu1 %v424_v8 }
  0xc7   : > { %556 = vmatprep.mubr.f32.mxu0 %v411_v9  ;;  %596 = vmatprep.mubr.f32.mxu1 %v427_v10  ;;  %v389_v9 = vld [vmem:[#allocation2 + $0x38] sm:$0xff] }
  0xc8   : > { %v397_v10 = vld [vmem:[#allocation2 + $0x78] sm:$0xff] }
  0xca   : > { %557 = vmatmul.mubr.f32.gmra.mrb[12].mxu0 %v410_v11  ;;  %597 = vmatmul.mubr.f32.gmra.mrb[12].mxu1 %v426_v12 }
  0xcb   : > { %561 = vmatprep.mubr.f32.mxu0 %v413_v13  ;;  %601 = vmatprep.mubr.f32.mxu1 %v429_v14 }
  0xce   : > { %562 = vmatmul.mubr.f32.gmra.mrb[14].mxu0 %v412_v15  ;;  %602 = vmatmul.mubr.f32.gmra.mrb[14].mxu1 %v428_v16 }
 0x185   : > { %v528_v19 = vpop.f32.mrb[0].mxu0  ;;  %v568_v20 = vpop.f32.mrb[0].mxu1 }
 0x186   : > { %v607_v21 = vadd.f32 %v528_v19, %v382_v17  ;;  %v615_v22 = vadd.f32 %v568_v20, %v390_v18  ;;  %v530_v23 = vpop.f32.mrb[1].mxu0  ;;  %v570_v24 = vpop.f32.mrb[1].mxu1 }
 0x188   : > { %623 = vst [vmem:[#allocation2] sm:$0xff] %v607_v21  ;;  %631 = vst [vmem:[#allocation2 + $0x40] sm:$0xff] %v615_v22 }
 0x189   : > { %v533_v27 = vpop.f32.mrb[2].mxu0  ;;  %v573_v28 = vpop.f32.mrb[2].mxu1 }
 0x18a   : > { %v608_v29 = vadd.f32 %v533_v27, %v383_v25  ;;  %v616_v30 = vadd.f32 %v573_v28, %v391_v26  ;;  %v535_v31 = vpop.f32.mrb[3].mxu0  ;;  %v575_v32 = vpop.f32.mrb[3].mxu1 }
 0x18c   : > { %624 = vst [vmem:[#allocation2 + $0x8] sm:$0xff] %v608_v29  ;;  %632 = vst [vmem:[#allocation2 + $0x48] sm:$0xff] %v616_v30 }
 0x18d   : > { %v538_v35 = vpop.f32.mrb[4].mxu0  ;;  %v578_v36 = vpop.f32.mrb[4].mxu1 }
 0x18e   : > { %v609_v37 = vadd.f32 %v538_v35, %v384_v33  ;;  %v617_v38 = vadd.f32 %v578_v36, %v392_v34  ;;  %v540_v39 = vpop.f32.mrb[5].mxu0  ;;  %v580_v40 = vpop.f32.mrb[5].mxu1 }
 0x18f   : > { %v643_v17 = vld [vmem:[#allocation2] sm:$0xff] (!%p917_p8) }
 0x190   : > { %625 = vst [vmem:[#allocation2 + $0x10] sm:$0xff] %v609_v37  ;;  %633 = vst [vmem:[#allocation2 + $0x50] sm:$0xff] %v617_v38  ;;  %v918_v20 = vmul.f32 (!%p917_p8), -1.442695, %v643_v17  ;;  %v651_v31 = vld [vmem:[#allocation2 + $0x40] sm:$0xff] (!%p917_p8) }
 0x191   : > { %v543_v43 = vpop.f32.mrb[6].mxu0  ;;  %v583_v44 = vpop.f32.mrb[6].mxu1  ;;  %v926_v36 = vmul.f32 (!%p917_p8), -1.442695, %v651_v31 }
 0x192   : > { %v610_v45 = vadd.f32 %v543_v43, %v385_v41  ;;  %v618_v46 = vadd.f32 %v583_v44, %v393_v42  ;;  %v545_v47 = vpop.f32.mrb[7].mxu0  ;;  %v585_v48 = vpop.f32.mrb[7].mxu1  ;;  %1114 = vpow2.f32 (!%p917_p8), %v918_v20 }
 0x193   : > { %v644_v18 = vld [vmem:[#allocation2 + $0x8] sm:$0xff] (!%p917_p8) }
 0x194   : > { %626 = vst [vmem:[#allocation2 + $0x18] sm:$0xff] %v610_v45  ;;  %634 = vst [vmem:[#allocation2 + $0x58] sm:$0xff] %v618_v46  ;;  %v919_v21 = vmul.f32 (!%p917_p8), -1.442695, %v644_v18  ;;  %v652_v34 = vld [vmem:[#allocation2 + $0x48] sm:$0xff] (!%p917_p8) }
 0x195   : > { %v548_v51 = vpop.f32.mrb[8].mxu0  ;;  %v588_v52 = vpop.f32.mrb[8].mxu1  ;;  %v927_v38 = vmul.f32 (!%p917_p8), -1.442695, %v652_v34 }
 0x196   : > { %v611_v53 = vadd.f32 %v548_v51, %v386_v49  ;;  %v619_v54 = vadd.f32 %v588_v52, %v394_v50  ;;  %v550_v55 = vpop.f32.mrb[9].mxu0  ;;  %v590_v56 = vpop.f32.mrb[9].mxu1  ;;  %1116 = vpow2.f32 (!%p917_p8), %v919_v21 }
 0x197   : > { %v645_v19 = vld [vmem:[#allocation2 + $0x10] sm:$0xff] (!%p917_p8) }
 0x198   : > { %627 = vst [vmem:[#allocation2 + $0x20] sm:$0xff] %v611_v53  ;;  %635 = vst [vmem:[#allocation2 + $0x60] sm:$0xff] %v619_v54  ;;  %v920_v22 = vmul.f32 (!%p917_p8), -1.442695, %v645_v19  ;;  %v653_v35 = vld [vmem:[#allocation2 + $0x50] sm:$0xff] (!%p917_p8) }
 0x199   : > { %v553_v59 = vpop.f32.mrb[10].mxu0  ;;  %v593_v60 = vpop.f32.mrb[10].mxu1  ;;  %v928_v40 = vmul.f32 (!%p917_p8), -1.442695, %v653_v35 }
 0x19a   : > { %v612_v61 = vadd.f32 %v553_v59, %v387_v57  ;;  %v620_v62 = vadd.f32 %v593_v60, %v395_v58  ;;  %v555_v63 = vpop.f32.mrb[11].mxu0  ;;  %v595_v0 = vpop.f32.mrb[11].mxu1  ;;  %1118 = vpow2.f32 (!%p917_p8), %v920_v22 }
 0x19b   : > { %v646_v23 = vld [vmem:[#allocation2 + $0x18] sm:$0xff] (!%p917_p8) }
 0x19c   : > { %628 = vst [vmem:[#allocation2 + $0x28] sm:$0xff] %v612_v61  ;;  %636 = vst [vmem:[#allocation2 + $0x68] sm:$0xff] %v620_v62  ;;  %v921_v26 = vmul.f32 (!%p917_p8), -1.442695, %v646_v23  ;;  %v654_v37 = vld [vmem:[#allocation2 + $0x58] sm:$0xff] (!%p917_p8)  ;;  %v1115_v43 = vpop.eup (!%p917_p8), %1114 }
 0x19d   : > { %v558_v3 = vpop.f32.mrb[12].mxu0  ;;  %v598_v4 = vpop.f32.mrb[12].mxu1  ;;  %v929_v41 = vmul.f32 (!%p917_p8), -1.442695, %v654_v37  ;;  %v707_v45 = vadd.f32 (!%p917_p8), 1.0, %v1115_v43 }
 0x19e   : > { %v613_v5 = vadd.f32 %v558_v3, %v388_v1  ;;  %v621_v6 = vadd.f32 %v598_v4, %v396_v2  ;;  %v560_v7 = vpop.f32.mrb[13].mxu0  ;;  %v600_v8 = vpop.f32.mrb[13].mxu1  ;;  %642 = sbr.rel (%p917_p8) target bundleno = 476 (0x1dc), region = 82  ;;  %1120 = vpow2.f32 (!%p917_p8), %v921_v26 }
 0x19f   : > { %v647_v24 = vld [vmem:[#allocation2 + $0x20] sm:$0xff] (!%p917_p8) }
 0x1a0   : > { %629 = vst [vmem:[#allocation2 + $0x30] sm:$0xff] %v613_v5  ;;  %637 = vst [vmem:[#allocation2 + $0x70] sm:$0xff] %v621_v6  ;;  %v922_v27 = vmul.f32 (!%p917_p8), -1.442695, %v647_v24  ;;  %v655_v39 = vld [vmem:[#allocation2 + $0x60] sm:$0xff] (!%p917_p8)  ;;  %v1117_v44 = vpop.eup (!%p917_p8), %1116 }
 0x1a1   : > { %v563_v11 = vpop.f32.mrb[14].mxu0  ;;  %v603_v12 = vpop.f32.mrb[14].mxu1  ;;  %v930_v42 = vmul.f32 (!%p917_p8), -1.442695, %v655_v39  ;;  %v708_v47 = vadd.f32 (!%p917_p8), 1.0, %v1117_v44 }
 0x1a2   : > { %v614_v13 = vadd.f32 %v563_v11, %v389_v9  ;;  %v622_v14 = vadd.f32 %v603_v12, %v397_v10  ;;  %v565_v15 = vpop.f32.mrb[15].mxu0  ;;  %v605_v16 = vpop.f32.mrb[15].mxu1  ;;  %1122 = vpow2.f32 (!%p917_p8), %v922_v27 }
 0x1a3   : > { %v648_v25 = vld [vmem:[#allocation2 + $0x28] sm:$0xff] (!%p917_p8) }
 0x1a4   : > { %630 = vst [vmem:[#allocation2 + $0x38] sm:$0xff] %v614_v13  ;;  %638 = vst [vmem:[#allocation2 + $0x78] sm:$0xff] %v622_v14  ;;  %v923_v28 = vmul.f32 (!%p917_p8), -1.442695, %v648_v25  ;;  %v1119_v46 = vpop.eup (!%p917_p8), %1118  ;;  %v656_v62 = vld [vmem:[#allocation2 + $0x68] sm:$0xff] (!%p917_p8) }
 0x1a5   : > { %v709_v49 = vadd.f32 1.0, %v1119_v46  ;;  %v931_v7 = vmul.f32 -1.442695, %v656_v62 }
 0x1a6   : > { %1124 = vpow2.f32 %v923_v28 }
 0x1a7   : > { %v649_v29 = vld [vmem:[#allocation2 + $0x30] sm:$0xff] }
 0x1a8   : > { %v924_v32 = vmul.f32 -1.442695, %v649_v29  ;;  %v1121_v48 = vpop.eup %1120  ;;  %v657_v1 = vld [vmem:[#allocation2 + $0x70] sm:$0xff] }
 0x1a9   : > { %v710_v51 = vadd.f32 1.0, %v1121_v48  ;;  %v932_v10 = vmul.f32 -1.442695, %v657_v1 }
 0x1aa   : > { %1126 = vpow2.f32 %v924_v32 }
 0x1ab   : > { %v650_v30 = vld [vmem:[#allocation2 + $0x38] sm:$0xff] }
 0x1ac   : > { %v925_v33 = vmul.f32 -1.442695, %v650_v30  ;;  %v1123_v50 = vpop.eup %1122  ;;  %v658_v4 = vld [vmem:[#allocation2 + $0x78] sm:$0xff] }
 0x1ad   : > { %v711_v53 = vadd.f32 1.0, %v1123_v50  ;;  %v933_v12 = vmul.f32 -1.442695, %v658_v4 }
 0x1ae   : > { %1128 = vpow2.f32 %v925_v33 }
 0x1af   : > { %1130 = vpow2.f32 %v926_v36 }
 0x1b0   : > { %1132 = vpow2.f32 %v927_v38  ;;  %v1125_v52 = vpop.eup %1124 }
 0x1b1   : > { %1134 = vpow2.f32 %v928_v40  ;;  %v712_v55 = vadd.f32 1.0, %v1125_v52 }
 0x1b2   : > { %1136 = vpow2.f32 %v929_v41 }
 0x1b3   : > { %1138 = vpow2.f32 %v930_v42 }
 0x1b4   : > { %1140 = vrcp.f32 %v707_v45  ;;  %v1127_v54 = vpop.eup %1126 }
 0x1b5   : > { %1142 = vrcp.f32 %v708_v47  ;;  %v713_v57 = vadd.f32 1.0, %v1127_v54 }
 0x1b6   : > { %1144 = vrcp.f32 %v709_v49 }
 0x1b7   : > { %1146 = vrcp.f32 %v710_v51 }
 0x1b8   : > { %v1129_v56 = vpop.eup %1128  ;;  %1148 = vrcp.f32 %v711_v53 }
 0x1b9   : > { %v1131_v58 = vpop.eup %1130  ;;  %1150 = vrcp.f32 %v712_v55  ;;  %v714_v59 = vadd.f32 1.0, %v1129_v56 }
 0x1ba   : > { %v1133_v60 = vpop.eup %1132  ;;  %1152 = vrcp.f32 %v713_v57  ;;  %v715_v61 = vadd.f32 1.0, %v1131_v58 }
 0x1bb   : > { %v1135_v63 = vpop.eup %1134  ;;  %1154 = vrcp.f32 %v714_v59  ;;  %v716_v0 = vadd.f32 1.0, %v1133_v60 }
 0x1bc   : > { %v1137_v2 = vpop.eup %1136  ;;  %1156 = vrcp.f32 %v715_v61  ;;  %v717_v3 = vadd.f32 1.0, %v1135_v63 }
 0x1bd   : > { %v1139_v5 = vpop.eup %1138  ;;  %1158 = vrcp.f32 %v716_v0  ;;  %v718_v6 = vadd.f32 1.0, %v1137_v2 }
 0x1be   : > { %v1141_v8 = vpop.eup %1140  ;;  %1160 = vrcp.f32 %v717_v3  ;;  %v719_v9 = vadd.f32 1.0, %v1139_v5 }
 0x1bf   : > { %v1143_v11 = vpop.eup %1142  ;;  %755 = vst [vmem:[%s1636_s29] sm:$0xff] %v1141_v8  ;;  %1162 = vrcp.f32 %v718_v6 }
 0x1c0   : > { %v1145_v13 = vpop.eup %1144  ;;  %756 = vst [vmem:[%s1636_s29 + $0x8] sm:$0xff] %v1143_v11  ;;  %1164 = vrcp.f32 %v719_v9 }
 0x1c1   : > { %v1147_v14 = vpop.eup %1146  ;;  %757 = vst [vmem:[%s1636_s29 + $0x10] sm:$0xff] %v1145_v13  ;;  %1166 = vpow2.f32 %v931_v7 }
 0x1c2   : > { %v1149_v15 = vpop.eup %1148  ;;  %758 = vst [vmem:[%s1636_s29 + $0x18] sm:$0xff] %v1147_v14  ;;  %1168 = vpow2.f32 %v932_v10 }
 0x1c3   : > { %v1151_v16 = vpop.eup %1150  ;;  %759 = vst [vmem:[%s1636_s29 + $0x20] sm:$0xff] %v1149_v15  ;;  %1170 = vpow2.f32 %v933_v12 }
 0x1c4   : > { %v1153_v17 = vpop.eup %1152  ;;  %760 = vst [vmem:[%s1636_s29 + $0x28] sm:$0xff] %v1151_v16 }
 0x1c5   : > { %v1155_v18 = vpop.eup %1154  ;;  %761 = vst [vmem:[%s1636_s29 + $0x30] sm:$0xff] %v1153_v17 }
 0x1c6   : > { %v1157_v19 = vpop.eup %1156  ;;  %762 = vst [vmem:[%s1636_s29 + $0x38] sm:$0xff] %v1155_v18 }
 0x1c7   : > { %v1159_v20 = vpop.eup %1158  ;;  %763 = vst [vmem:[%s1636_s29 + $0x40] sm:$0xff] %v1157_v19 }
 0x1c8   : > { %v1161_v21 = vpop.eup %1160  ;;  %764 = vst [vmem:[%s1636_s29 + $0x48] sm:$0xff] %v1159_v20 }
 0x1c9   : > { %v1163_v22 = vpop.eup %1162  ;;  %765 = vst [vmem:[%s1636_s29 + $0x50] sm:$0xff] %v1161_v21 }
 0x1ca   : > { %v1165_v23 = vpop.eup %1164  ;;  %766 = vst [vmem:[%s1636_s29 + $0x58] sm:$0xff] %v1163_v22 }
 0x1cb   : > { %v1167_v24 = vpop.eup %1166  ;;  %767 = vst [vmem:[%s1636_s29 + $0x60] sm:$0xff] %v1165_v23 }
 0x1cc   : > { %v1169_v25 = vpop.eup %1168  ;;  %v720_v26 = vadd.f32 1.0, %v1167_v24 }
 0x1cd   : > { %v1171_v27 = vpop.eup %1170  ;;  %v721_v28 = vadd.f32 1.0, %v1169_v25 }
 0x1ce   : > { %1172 = vrcp.f32 %v720_v26  ;;  %v722_v29 = vadd.f32 1.0, %v1171_v27 }
 0x1cf   : > { %1174 = vrcp.f32 %v721_v28 }
 0x1d0   : > { %1176 = vrcp.f32 %v722_v29 }
 0x1d8   : > { %v1173_v30 = vpop.eup %1172 }
 0x1d9   : > { %v1175_v31 = vpop.eup %1174  ;;  %768 = vst [vmem:[%s1636_s29 + $0x68] sm:$0xff] %v1173_v30 }
 0x1da   : > { %v1177_v32 = vpop.eup %1176  ;;  %769 = vst [vmem:[%s1636_s29 + $0x70] sm:$0xff] %v1175_v31 }
 0x1db   : > { %770 = vst [vmem:[%s1636_s29 + $0x78] sm:$0xff] %v1177_v32 }
 0x1dc PF: > { %s1827_s12 = sld [smem:[#allocation9_spill]]  ;;  %s1828_s14 = sld [smem:[#allocation8_spill]] }
 0x1dd   : > { %s787_s4 = sshll.u32 %s1636_s29, 4  ;;  %s1829_s23 = sld [smem:[#allocation13_spill]]  ;;  %s1723_s4 = int_to_ptr.vmem [resolvable:$true] %s787_s4 }
 0x1de   : > { %s1732_s0 = scalar_lea.sflag [#allocation6], %s354_s25  ;;  %s1178_s26 = scalar_lea.vmem %s1723_s4, 2048 }
 0x1df   : > { %p1179_p9 = scmp.ne.s32.totalorder %s1723_s4, %s1178_s26  ;;  %s1323_s28 = smov [#allocation5]  }
 0x1e0   : > { %s1182_s29 = sshll.u32 %s1323_s28, 4  ;;  %s1183_s29 = int_to_ptr.vmem [resolvable:$false] %s1182_s29 }
 0x1e1   : > { %p1180_p10 = pnand %p1179_p9, %p1462_p0  ;;  %p1185_p12 = scmp.lt.s32.totalorder %s1723_s4, %s1183_s29 }
 0x1e2   : > { %s942_s16 = sshll.u32 %s1827_s12, 5  ;;  %s1184_s12 = scalar_lea.vmem %s1183_s29, 4096 }
 0x1e3   : > { %s784_s18 = sadd.s32 %s1828_s14, %s942_s16  ;;  %p1181_p11 = pneg %p1180_p10 }
 0x1e4   : > { %s937_s5 = sshll.u32 %s784_s18, 7  ;;  %p1186_p13 = scmp.lt.s32.totalorder %s1184_s12, %s1178_s26 }
 0x1e5   : > { %s1728_s24 = scalar_lea.hbm %s1829_s23, %s937_s5 }
 0x1e6   : > { %p1187_p1 = por %p1186_p13, %p1185_p12 }
 0x1e8   : > { %p1188_p3 = pnand %p1187_p1, %p1181_p11 }
 0x1ea   : > { %1191 = shalt.err (!%p1188_p3)
}
 0x1eb   : > { %s1192_s25 = scalar_lea.hbm %s1728_s24, 2048  ;;  %s1196_s18 = scalar_lea.hbm %s1829_s23, 8192 }
 0x1ec   : > { %p1193_p4 = scmp.ne.s32.totalorder %s1728_s24, %s1192_s25  ;;  %p1197_p7 = scmp.lt.u32.totalorder %s1728_s24, %s1829_s23 }
 0x1ed   : > { %p1198_p8 = scmp.lt.u32.totalorder %s1196_s18, %s1192_s25  ;;  %p1200_p10 = scmp.lt.u32.totalorder %s1192_s25, %s1728_s24 }
 0x1ee   : > { %p1194_p5 = pnand %p1193_p4, %p1462_p0 }
 0x1ef   : > { %p1199_p9 = por %p1198_p8, %p1197_p7 }
 0x1f0   : > { %p1195_p6 = pneg %p1194_p5 }
 0x1f1   : > { %p1201_p11 = por %p1200_p10, %p1199_p9 }
 0x1f3   : > { %p1202_p12 = pnand %p1201_p11, %p1195_p6 }
 0x1f5   : > { %1205 = shalt.err (!%p1202_p12)
}
 0x1f6   : > { %s1324_s3 = smov 128   ;;  %s1325_s26 = smov 256  }
 0x1f7   : > { %s1326_s28 = smov 8  }
 0x1f8   : > { %991 = dma.vmem_to_hbm [thread:$0]  (%p1462_p0), %s1723_s4, 2048, %s1728_s24, %s1732_s0, %s1324_s3, %s1325_s26, %s1326_s28  }
 0x1f9 PF: > { %p997_p13 = scmp.ge.s32.totalorder %s1320_s22, 2  ;;  %s802_s29 = sand.u32 1, %s1268_s9  }
 0x1fa   : > { %s803_s12 = scalar_lea.sflag [#allocation6], %s802_s29 }
 0x1fb   : > { %p994_p1 = pnand %p997_p13, %p1468_p2 }
 0x1fd   : > { %1263 = dma.done.wait (!%p994_p1), %s803_s12, 2048  }
 0x1fe   : > { %1265 = vsyncadd (!%p994_p1), %s803_s12, 4294965248  ;;  %s15_s22 = sadd.s32 1, %s1320_s22   ;;  %s1831_s6 = sld [smem:[#allocation10_spill]] }
 0x1ff   : > { %p1761_p3 = scmp.ge.s32.totalorder %s15_s22, 18   ;;  %s1832_s30 = sld [smem:[#allocation11_spill]] }
 0x200   : > { %s1833_s9 = smov %s1272_s10  ;;  %s1834_s10 = smov %s1276_s11 }
 0x201   : > { %s1835_s11 = smov %s1460_s17  ;;  %s1836_s12 = smov %s1284_s13 }
 0x202   : > { %s1837_s13 = smov %s1446_s8  ;;  %s1838_s14 = smov %s1292_s15 }
 0x203   : > { %s1839_s15 = smov %s1457_s2  ;;  %s1840_s16 = smov %s1308_s19 }
 0x204   : > { %s1841_s17 = smov %s1312_s20  ;;  %s1842_s18 = smov %s1316_s21 }
 0x205   : > { %s1843_s19 = smov %s1831_s6  ;;  %s1844_s20 = smov %s1832_s30 }
 0x206   : > { %s1845_s21 = smov %s1855_s27  ;;  %14 = sbr.rel (!%p1761_p3) target bundleno = 11 (0xb), region = 130 }
 0x20d   :  { %808 = vsyncpa [#allocation6], 1 }
 0x20e   :  { %810 = vsyncpa [#allocation6 + $0x1], 1 }

// kernel: hetero_dot_product_predictor.2
= control target key start
LH: loop header
LB: loop body
LE: loop exit
PB: predicated region body
PF: predicated region fallthrough
CT: control target
= control target key end

     0   :  { %s2261_s0 = inlined_call_operand.hbm [shape: f32[256,1024], index: 0, kind: input, shape index: {}]   ;;  %s2262_s1 = inlined_call_operand.hbm [shape: f32[1024,1024], index: 1, kind: input, shape index: {}]   ;;  %s2263_s2 = inlined_call_operand.hbm [shape: f32[1,1024], index: 2, kind: input, shape index: {}]   ;;  %s2264_s3 = inlined_call_operand.vmem [shape: f32[256,1024], index: 3, kind: output, shape index: {}]  }
   0x1   :  { %2284 = sst [smem:[#allocation27_spill]] %s2262_s1 }
   0x2   :  { %2285 = sst [smem:[#allocation28_spill]] %s2263_s2 }
   0x3   :  { %2286 = sst [smem:[#allocation29_spill]] %s2264_s3 }
   0x4   :  { %8 = vsyncpa [#allocation4], 0 }
   0x5   :  { %10 = vsyncpa [#allocation4 + $0x1], 0 }
   0x6   :  { %11 = vsyncpa [#allocation6], 0 }
   0x7   :  { %13 = vsyncpa [#allocation6 + $0x1], 0  ;;  %s1591_s12 = smov 0   ;;  %s1593_s13 = smov 0  }
   0x8   :  { %s1595_s14 = smov 0   ;;  %s1597_s15 = smov 0  }
   0x9   :  { %s1599_s16 = smov 0   ;;  %s1601_s17 = smov 0  }
   0xa   :  { %s1603_s18 = smov 0   ;;  %s1605_s19 = smov 0  }
   0xb   :  { %s1607_s20 = smov 0   ;;  %s1609_s21 = smov 0  }
   0xc   :  { %s1611_s22 = smov 0   ;;  %s1613_s23 = smov 0  }
   0xd   :  { %s1615_s24 = smov 0   ;;  %s1617_s25 = smov 0  }
   0xe   :  { %s1619_s26 = smov 0   ;;  %s1621_s27 = smov 0  }
   0xf   :  { %s1623_s28 = smov 0   ;;  %s1625_s29 = smov 0  }
  0x10 LB: > { %2287 = sst [smem:[#allocation12_spill]] %s1494_s12  ;;  %s31_s30 = sadd.s32 1, %s1550_s26  ;;  %s1562_s29 = sphi %s1625_s29, %s19_s29   ;;  %s1558_s28 = sphi %s1623_s28, %s2368_s28   ;;  %s1554_s27 = sphi %s1621_s27, %s2367_s27   ;;  %s1550_s26 = sphi %s1619_s26, %s2353_s26   ;;  %s1546_s25 = sphi %s1617_s25, %s2366_s25   ;;  %s1542_s24 = sphi %s1615_s24, %s2365_s24   ;;  %s1538_s23 = sphi %s1613_s23, %s2352_s23   ;;  %s1534_s22 = sphi %s1611_s22, %s2364_s22   ;;  %s1530_s21 = sphi %s1609_s21, %s2363_s21   ;;  %s1526_s20 = sphi %s1607_s20, %s2362_s20   ;;  %s1522_s19 = sphi %s1605_s19, %s2351_s19   ;;  %s1518_s18 = sphi %s1603_s18, %s2350_s18   ;;  %s1514_s17 = sphi %s1601_s17, %s2361_s17   ;;  %s1510_s16 = sphi %s1599_s16, %s2360_s16   ;;  %s1506_s15 = sphi %s1597_s15, %s2359_s15   ;;  %s1502_s14 = sphi %s1595_s14, %s2348_s14   ;;  %s1498_s13 = sphi %s1593_s13, %s2357_s13   ;;  %s1494_s12 = sphi %s1591_s12, %s2355_s12  }
  0x11   : > { %2288 = sst [smem:[#allocation13_spill]] %s1502_s14  ;;  %s34_s4 = sadd.s32 1, %s1554_s27 }
  0x12   : > { %2289 = sst [smem:[#allocation14_spill]] %s1506_s15  ;;  %p32_p0 = scmp.ge.s32.totalorder %s31_s30, 4 }
  0x13   : > { %2290 = sst [smem:[#allocation15_spill]] %s1514_s17  ;;  %p2272_p1 = scmp.eq.s32.totalorder %s1562_s29, 0 }
  0x14   : > { %2291 = sst [smem:[#allocation16_spill]] %s1518_s18  ;;  %s75_s5 = sadd.s32 1, %s1522_s19 }
  0x15   : > { %2292 = sst [smem:[#allocation17_spill]] %s1522_s19  ;;  %p82_p2 = scmp.ne.s32.totalorder %s1522_s19, %s1518_s18 }
  0x16   : > { %2293 = sst [smem:[#allocation18_spill]] %s1538_s23  ;;  %s2370_s30 = smov (%p32_p0, %s31_s30), 0 }
  0x17   : > { %2294 = sst [smem:[#allocation19_spill]] %s1542_s24  ;;  %s2372_s4 = smov (!%p32_p0, %s34_s4), %s1554_s27 }
  0x18   : > { %2295 = sst [smem:[#allocation20_spill]] %s1546_s25  ;;  %s1694_s6 = ssub.s32 %s1550_s26, %s2370_s30 }
  0x19   : > { %2296 = sst [smem:[#allocation21_spill]] %s1550_s26  ;;  %p1698_p3 = por %p82_p2, %p2272_p1 }
  0x1a   : > { %2297 = sst [smem:[#allocation22_spill]] %s2370_s30  ;;  %p2273_p4 = scmp.ge.s32.totalorder %s2372_s4, 4 }
  0x1b   : > { %p2271_p6 = scmp.lt.s32.totalorder %s1562_s29, 32  ;;  %s190_s11 = sand.u32 1, %s1562_s29  }
  0x1c   : > { %s1709_s8 = scalar_select %p2273_p4, 0, %s2372_s4  }
  0x1d   : > { %s192_s30 = sand.u32 1, %s1522_s19   ;;  %s1033_s3 = sshll.u32 %s1554_s27, 1 }
  0x1e   : > { %2299 = sst [smem:[#allocation23_spill]] %s1709_s8  ;;  %s1713_s9 = ssub.s32 %s1554_s27, %s1709_s8 }
  0x1f   : > { %s72_s10 = sor.u32 %s1713_s9, %s1694_s6  ;;  %s1031_s24 = sshll.u32 %s192_s30, 9 }
  0x20   : > { %p73_p7 = scmp.eq.s32.totalorder %s72_s10, 0  ;;  %s1054_s23 = sshll.u32 %s1550_s26, 8 }
  0x21   : > { %s201_s2 = sadd.s32 %s1054_s23, %s1033_s3  ;;  %s194_s14 = scalar_lea.vmem [#allocation5], %s1031_s24 }
  0x22   : > { %s1721_s25 = scalar_select %p73_p7, %s1522_s19, %s75_s5  }
  0x23   : > { %s1035_s12 = sshll.u32 %s201_s2, 7  ;;  %s204_s15 = sshll.u32 %s194_s14, 4  ;;  %s1729_s15 = int_to_ptr.vmem [resolvable:$true] %s204_s15 }
  0x24   : > { %2300 = sst [smem:[#allocation24_spill]] %s1721_s25  ;;  %s2301_s1 = sld [smem:[#allocation27_spill]] }
  0x25   : > { %p1735_p8 = pnand %p2271_p6, %p1698_p3  ;;  %p231_p10 = scmp.lt.s32.totalorder %s1562_s29, 33 }
  0x26   : > { %s1741_s2 = scalar_lea.sflag [#allocation6], %s190_s11 }
  0x27   : > { %2303 = sst [smem:[#allocation25_spill]] %s1741_s2  ;;  %p1320_p12 = pneg %p1735_p8 }
  0x2a   : > { %s1727_s8 = scalar_lea.hbm %s2301_s1, %s1035_s12  ;;  %s1323_s17 = scalar_lea.hbm %s2301_s1, 131072 }
  0x2b   : > { %s1318_s3 = scalar_lea.hbm %s1727_s8, 8192  ;;  %p1324_p2 = scmp.lt.u32.totalorder %s1727_s8, %s2301_s1 }
  0x2c   : > { %p1319_p11 = scmp.ne.s32.totalorder %s1727_s8, %s1318_s3  ;;  %p1325_p3 = scmp.lt.u32.totalorder %s1323_s17, %s1318_s3 }
  0x2d   : > { %p1327_p5 = scmp.lt.u32.totalorder %s1318_s3, %s1727_s8 }
  0x2e   : > { %p1321_p13 = pnand %p1320_p12, %p1319_p11  ;;  %p1326_p7 = por %p1325_p3, %p1324_p2 }
  0x30   : > { %p1322_p0 = pneg %p1321_p13  ;;  %p1328_p6 = por %p1327_p5, %p1326_p7 }
  0x32   : > { %p1329_p1 = pnand %p1328_p6, %p1322_p0 }
  0x34   : > { %1332 = shalt.err (!%p1329_p1)
}
  0x35   : > { %s1333_s24 = scalar_lea.vmem %s1729_s15, 8192  ;;  %s1564_s5 = smov [#allocation5]  }
  0x36   : > { %p1334_p11 = scmp.ne.s32.totalorder %s1729_s15, %s1333_s24  ;;  %s1338_s7 = sshll.u32 %s1564_s5, 4  ;;  %s1339_s7 = int_to_ptr.vmem [resolvable:$false] %s1338_s7 }
  0x37   : > { %s1340_s10 = scalar_lea.vmem %s1339_s7, 16384  ;;  %p1341_p9 = scmp.lt.s32.totalorder %s1729_s15, %s1339_s7 }
  0x38   : > { %p1336_p13 = pnand %p1334_p11, %p1320_p12  ;;  %p1342_p2 = scmp.lt.s32.totalorder %s1340_s10, %s1333_s24 }
  0x3a   : > { %p1337_p4 = pneg %p1336_p13  ;;  %p1343_p3 = por %p1342_p2, %p1341_p9 }
  0x3c   : > { %p1344_p5 = pnand %p1343_p3, %p1337_p4 }
  0x3e   : > { %1347 = shalt.err (!%p1344_p5)
}
  0x3f   : > { %s2274_s11 = smov 1024   ;;  %s2275_s3 = smov 256  }
  0x40   : > { %s2276_s12 = smov 16   ;;  %p2304_p1 = scmp.ge.s32.totalorder %s1562_s29, 1 }
  0x41   : > { %1165 = dma.hbm_to_vmem [thread:$0]  (!%p1735_p8), %s1727_s8, 8192, %s1729_s15, %s1741_s2, %s2274_s11, %s2275_s3, %s2276_s12  }
  0x42   : > { %p1776_p4 = pnand %p2304_p1, %p231_p10  ;;  %s38_s17 = sadd.s32 1, %s1558_s28 }
  0x43   : > { %p2307_p6 = scmp.ge.s32.totalorder %s2372_s4, 4  ;;  %s47_s18 = sadd.s32 1, %s1534_s22 }
  0x44   : > { %s2305_s14 = scalar_select %p1776_p4, 1, 0 }
  0x45   : > { %s2374_s17 = smov (!%p2307_p6, %s38_s17), %s1558_s28  ;;  %p54_p9 = scmp.ne.s32.totalorder %s1534_s22, %s1530_s21 }
  0x46   : > { %2306 = sst [smem:[#allocation26_spill]] %s2305_s14  ;;  %p40_p12 = scmp.ge.s32.totalorder %s2374_s17, 2 }
  0x47   : > { %p2308_p7 = scmp.eq.s32.totalorder %s1562_s29, 0  ;;  %s129_s15 = sadd.s32 1, %s1498_s13 }
  0x48   : > { %s2376_s17 = smov (%p40_p12, %s2374_s17), 0  ;;  %s166_s8 = sand.u32 1, %s1534_s22  }
  0x49   : > { %p1791_p11 = por %p2308_p7, %p54_p9  ;;  %s1028_s23 = sshll.u32 %s1550_s26, 1 }
  0x4a   : > { %s42_s4 = ssub.s32 %s1558_s28, %s2376_s17  ;;  %s1026_s7 = sshll.u32 %s166_s8, 8 }
  0x4b   : > { %s44_s24 = sor.u32 %s1694_s6, %s42_s4  ;;  %s126_s5 = sor.u32 %s1713_s9, %s42_s4 }
  0x4c   : > { %p45_p8 = scmp.eq.s32.totalorder %s44_s24, 0  ;;  %p127_p10 = scmp.eq.s32.totalorder %s126_s5, 0 }
  0x4d   : > { %s1053_s10 = sshll.u32 %s1558_s28, 7  ;;  %s170_s25 = scalar_lea.vmem [#allocation3], %s1026_s7 }
  0x4e   : > { %s1806_s11 = scalar_select %p45_p8, %s1534_s22, %s47_s18  }
  0x4f   : > { %s1809_s3 = scalar_select %p127_p10, %s1498_s13, %s129_s15  }
  0x50   : > { %s177_s12 = sadd.s32 %s1053_s10, %s1028_s23  ;;  %s180_s19 = sshll.u32 %s170_s25, 4  ;;  %s1816_s19 = int_to_ptr.vmem [resolvable:$true] %s180_s19 }
  0x51   : > { %s1030_s1 = sshll.u32 %s177_s12, 7  ;;  %p2310_p13 = scmp.lt.s32.totalorder %s1562_s29, 32 }
  0x52   : > { %s1814_s26 = scalar_lea.hbm %s2261_s0, %s1030_s1  ;;  %s1826_s25 = scalar_lea.sflag [#allocation4], %s166_s8 }
  0x53   : > { %p1822_p2 = pnand %p2310_p13, %p1791_p11  ;;  %s1348_s12 = scalar_lea.hbm %s1814_s26, 4096 }
  0x54   : > { %p1349_p3 = scmp.ne.s32.totalorder %s1814_s26, %s1348_s12  ;;  %s1353_s14 = scalar_lea.hbm %s2261_s0, 32768 }
  0x55   : > { %p1350_p5 = pneg %p1822_p2  ;;  %p1354_p9 = scmp.lt.u32.totalorder %s1814_s26, %s2261_s0 }
  0x56   : > { %p1355_p12 = scmp.lt.u32.totalorder %s1353_s14, %s1348_s12  ;;  %p1357_p11 = scmp.lt.u32.totalorder %s1348_s12, %s1814_s26 }
  0x57   : > { %p1351_p1 = pnand %p1350_p5, %p1349_p3 }
  0x58   : > { %p1356_p7 = por %p1355_p12, %p1354_p9 }
  0x59   : > { %p1352_p6 = pneg %p1351_p1 }
  0x5a   : > { %p1358_p8 = por %p1357_p11, %p1356_p7 }
  0x5c   : > { %p1359_p10 = pnand %p1358_p8, %p1352_p6 }
  0x5e   : > { %1362 = shalt.err (!%p1359_p10)
}
  0x5f   : > { %s1363_s15 = scalar_lea.vmem %s1816_s19, 4096  ;;  %s1568_s8 = smov [#allocation3]  }
  0x60   : > { %p1364_p13 = scmp.ne.s32.totalorder %s1816_s19, %s1363_s15  ;;  %s1368_s23 = sshll.u32 %s1568_s8, 4  ;;  %s1369_s23 = int_to_ptr.vmem [resolvable:$false] %s1368_s23 }
  0x61   : > { %s1370_s4 = scalar_lea.vmem %s1369_s23, 8192  ;;  %p1371_p0 = scmp.lt.s32.totalorder %s1816_s19, %s1369_s23 }
  0x62   : > { %p1366_p3 = pnand %p1364_p13, %p1350_p5  ;;  %p1372_p9 = scmp.lt.s32.totalorder %s1370_s4, %s1363_s15 }
  0x64   : > { %p1367_p1 = pneg %p1366_p3  ;;  %p1373_p12 = por %p1372_p9, %p1371_p0 }
  0x66   : > { %p1374_p7 = pnand %p1373_p12, %p1367_p1 }
  0x68   : > { %1377 = shalt.err (!%p1374_p7)
}
  0x69   : > { %s2312_s24 = smov 16   ;;  %s2313_s5 = smov 256  }
  0x6a   : > { %s2314_s7 = smov 1024   ;;  %s2315_s10 = sld [smem:[#allocation16_spill]] }
  0x6b   : > { %s2316_s12 = sld [smem:[#allocation15_spill]]  ;;  %s2317_s1 = sld [smem:[#allocation14_spill]] }
  0x6c   : > { %s2318_s2 = sld [smem:[#allocation13_spill]]  ;;  %s2319_s14 = sld [smem:[#allocation12_spill]] }
  0x6d   : > { %1162 = dma.hbm_to_vmem [thread:$0]  (!%p1822_p2), %s1814_s26, 4096, %s1816_s19, %s1826_s25, %s2314_s7, %s2313_s5, %s2312_s24  }
  0x6e   : > { %s1858_s6 = sadd.s32 4294967295, %s1562_s29   ;;  %p99_p0 = scmp.eq.s32.totalorder %s1713_s9, 0 }
  0x6f   : > { %p61_p5 = scmp.eq.s32.totalorder %s1858_s6, 0  ;;  %s101_s18 = sadd.s32 1, %s1510_s16 }
  0x70   : > { %s1864_s30 = scalar_select %p99_p0, %s1510_s16, %s101_s18  }
  0x71   : > { %p2320_p6 = scmp.ne.s32.totalorder %s1530_s21, %s1526_s20  ;;  %p2322_p8 = scmp.ne.s32.totalorder %s2315_s10, %s2316_s12 }
  0x72   : > { %p108_p2 = scmp.ne.s32.totalorder %s1510_s16, %s2317_s1  ;;  %p114_p13 = scmp.ne.s32.totalorder %s2317_s1, %s2318_s2 }
  0x73   : > { %p1869_p11 = por %p61_p5, %p2320_p6  ;;  %p1876_p10 = por %p2322_p8, %p61_p5 }
  0x74   : > { %p139_p3 = scmp.ne.s32.totalorder %s1498_s13, %s2319_s14  ;;  %p140_p1 = scmp.eq.s32.totalorder %s1858_s6, 31 }
  0x75   : > { %s2321_s15 = scalar_select %p1869_p11, 1, 0 }
  0x76   : > { %s2323_s8 = scalar_select %p1876_p10, 1, 0 }
  0x77   : > { %p2324_p9 = scmp.eq.s32.totalorder %s1562_s29, 0  ;;  %p1889_p7 = por %p114_p13, %p61_p5 }
  0x78   : > { %p1893_p0 = por %p140_p1, %p139_p3  ;;  %s216_s26 = sand.u32 1, %s1510_s16  }
  0x79   : > { %p110_p12 = por %p108_p2, %p2324_p9  ;;  %s1036_s9 = sshll.u32 %s216_s26, 1 }
  0x7a   : > { %s2325_s19 = scalar_select %p1889_p7, 1, 0 }
  0x7b   : > { %s2326_s20 = scalar_select %p1893_p0, 1, 0 }
  0x7c   : > { %s1055_s25 = sshll.u32 %s1554_s27, 5  ;;  %s2327_s24 = sld [smem:[#allocation28_spill]] }
  0x7d   : > { %s218_s10 = scalar_lea.vmem [#allocation7], %s1036_s9  ;;  %p2329_p5 = scmp.lt.s32.totalorder %s1562_s29, 32 }
  0x7e   : > { %s226_s12 = sshll.u32 %s218_s10, 4  ;;  %s227_s12 = int_to_ptr.vmem [resolvable:$true] %s226_s12 }
  0x7f   : > { %p1906_p6 = pnand %p2329_p5, %p110_p12 }
  0x81   : > { %p1380_p2 = pneg %p1906_p6 }
  0x82   : > { %s2328_s5 = smov %s2327_s24  ;;  %s1902_s7 = scalar_lea.hbm %s2327_s24, %s1055_s25 }
  0x83   : > { %s1378_s2 = scalar_lea.hbm %s1902_s7, 32  ;;  %s1383_s26 = scalar_lea.hbm %s2328_s5, 128 }
  0x84   : > { %p1379_p8 = scmp.ne.s32.totalorder %s1902_s7, %s1378_s2  ;;  %p1384_p1 = scmp.lt.u32.totalorder %s1902_s7, %s2328_s5 }
  0x85   : > { %p1385_p9 = scmp.lt.u32.totalorder %s1383_s26, %s1378_s2  ;;  %p1387_p5 = scmp.lt.u32.totalorder %s1378_s2, %s1902_s7 }
  0x86   : > { %p1381_p13 = pnand %p1380_p2, %p1379_p8 }
  0x87   : > { %p1386_p12 = por %p1385_p9, %p1384_p1 }
  0x88   : > { %p1382_p3 = pneg %p1381_p13 }
  0x89   : > { %p1388_p0 = por %p1387_p5, %p1386_p12 }
  0x8b   : > { %p1389_p7 = pnand %p1388_p0, %p1382_p3 }
  0x8d   : > { %1392 = shalt.err (!%p1389_p7)
}
  0x8e   : > { %s1393_s23 = scalar_lea.vmem %s227_s12, 32  ;;  %s1569_s4 = smov [#allocation7]  }
  0x8f   : > { %p1394_p10 = scmp.ne.s32.totalorder %s227_s12, %s1393_s23  ;;  %s1398_s24 = sshll.u32 %s1569_s4, 4  ;;  %s1399_s24 = int_to_ptr.vmem [resolvable:$false] %s1398_s24 }
  0x90   : > { %s1400_s10 = scalar_lea.vmem %s1399_s24, 64  ;;  %p1401_p11 = scmp.lt.s32.totalorder %s227_s12, %s1399_s24 }
  0x91   : > { %p1396_p8 = pnand %p1394_p10, %p1380_p2  ;;  %p1402_p4 = scmp.lt.s32.totalorder %s1400_s10, %s1393_s23 }
  0x93   : > { %p1397_p13 = pneg %p1396_p8  ;;  %p1403_p1 = por %p1402_p4, %p1401_p11 }
  0x95   : > { %p1404_p9 = pnand %p1403_p1, %p1397_p13 }
  0x97   : > { %1407 = shalt.err (!%p1404_p9)
}
  0x98   : > { %s2331_s2 = sld [smem:[#allocation25_spill]]  ;;  %s2332_s14 = sld [smem:[#allocation26_spill]] }
  0x9e   : > { %1168 = dma.hbm_to_vmem [thread:$0]  (!%p1906_p6), %s1902_s7, 32, %s227_s12, %s2331_s2  }
  0x9f   : > { %p2333_p7 = scmp.ne.s32.totalorder %s2332_s14, 0 }
  0xa0   : > { %s237_s18 = sand.u32 (!%p2333_p7), 1, %s1530_s21   ;;  %p2334_p10 = scmp.ne.s32.totalorder (!%p2333_p7), %s2321_s15, 0 }
  0xa1   : > { %235 = sbr.rel (%p2333_p7) target bundleno = 562 (0x232), region = 32  ;;  %s1040_s26 = sshll.u32 (!%p2333_p7), %s237_s18, 8 }
  0xa2   : > { %s238_s9 = scalar_lea.sflag (!%p2333_p7), [#allocation4], %s237_s18  ;;  %s1935_s25 = scalar_lea.vmem (!%p2333_p7), [#allocation3], %s1040_s26 }
  0xa8   : > { %1481 = dma.done.wait (%p2334_p10), %s238_s9, 4096  }
  0xa9   : > { %1483 = vsyncadd (%p2334_p10), %s238_s9, 4294963200  ;;  %s2335_s1 = sld [smem:[#allocation16_spill]]  ;;  %s246_s23 = sand.u32 1, %s1858_s6  }
  0xaa   : > { %s247_s4 = scalar_lea.sflag [#allocation6], %s246_s23  ;;  %p2336_p4 = scmp.ne.s32.totalorder %s2323_s8, 0 }
  0xaf   : > { %s248_s7 = sand.u32 1, %s2335_s1  }
  0xb0   : > { %s1041_s12 = sshll.u32 %s248_s7, 9 }
  0xb1   : > { %s1943_s24 = scalar_lea.vmem [#allocation5], %s1041_s12 }
  0xb2   : > { %1485 = dma.done.wait (%p2336_p4), %s247_s4, 8192  }
  0xb3   : > { %1487 = vsyncadd (%p2336_p4), %s247_s4, 4294959104  ;;  %s2337_s10 = sld [smem:[#allocation14_spill]]  ;;  %p2338_p11 = scmp.ne.s32.totalorder %s2325_s19, 0 }
  0xb9   : > { %s257_s2 = sand.u32 1, %s2337_s10  }
  0xba   : > { %s1950_s14 = sshll.u32 %s257_s2, 1 }
  0xbb   : > { %s259_s15 = scalar_lea.vmem [#allocation7], %s1950_s14 }
  0xbc   : > { %1489 = dma.done.wait (%p2338_p11), %s247_s4, 32  }
  0xbd   : > { %1491 = vsyncadd (%p2338_p11), %s247_s4, 4294967264  ;;  %s2339_s6 = sld [smem:[#allocation12_spill]]  ;;  %s2340_s1 = sld [smem:[#allocation18_spill]] }
  0xc3   : > { %s288_s18 = sand.u32 1, %s2339_s6   ;;  %p1044_p0 = scmp.ne.s32.totalorder %s2340_s1, 0 }
  0xc4   : > { %s1043_s26 = sshll.u32 %s288_s18, 8  ;;  %v1570_v0 = vmov (!%p1044_p0), 0.0  }
  0xc5   : > { %s1958_s9 = scalar_lea.vmem [#allocation8], %s1043_s26  ;;  %301 = sbr.rel (%p1044_p0) target bundleno = 213 (0xd5), region = 48  ;;  %302 = vst [vmem:[#allocation2] sm:$0xff] (!%p1044_p0), %v1570_v0  ;;  %303 = vst [vmem:[#allocation2 + $0x8] sm:$0xff] (!%p1044_p0), %v1570_v0 }
  0xc6   : > { %304 = vst [vmem:[#allocation2 + $0x10] sm:$0xff] (!%p1044_p0), %v1570_v0  ;;  %305 = vst [vmem:[#allocation2 + $0x18] sm:$0xff] (!%p1044_p0), %v1570_v0 }
  0xc7   : > { %306 = vst [vmem:[#allocation2 + $0x20] sm:$0xff] (!%p1044_p0), %v1570_v0  ;;  %307 = vst [vmem:[#allocation2 + $0x28] sm:$0xff] (!%p1044_p0), %v1570_v0 }
  0xc8   : > { %308 = vst [vmem:[#allocation2 + $0x30] sm:$0xff] (!%p1044_p0), %v1570_v0  ;;  %309 = vst [vmem:[#allocation2 + $0x38] sm:$0xff] (!%p1044_p0), %v1570_v0 }
  0xc9   : > { %310 = vst [vmem:[#allocation2 + $0x40] sm:$0xff] (!%p1044_p0), %v1570_v0  ;;  %311 = vst [vmem:[#allocation2 + $0x48] sm:$0xff] (!%p1044_p0), %v1570_v0 }
  0xca   : > { %312 = vst [vmem:[#allocation2 + $0x50] sm:$0xff] (!%p1044_p0), %v1570_v0  ;;  %313 = vst [vmem:[#allocation2 + $0x58] sm:$0xff] (!%p1044_p0), %v1570_v0 }
  0xcb   : > { %314 = vst [vmem:[#allocation2 + $0x60] sm:$0xff] (!%p1044_p0), %v1570_v0  ;;  %315 = vst [vmem:[#allocation2 + $0x68] sm:$0xff] (!%p1044_p0), %v1570_v0 }
  0xcc   : > { %316 = vst [vmem:[#allocation2 + $0x70] sm:$0xff] %v1570_v0  ;;  %317 = vst [vmem:[#allocation2 + $0x78] sm:$0xff] %v1570_v0 }
  0xcd   : > { %318 = vst [vmem:[#allocation2 + $0x80] sm:$0xff] %v1570_v0  ;;  %319 = vst [vmem:[#allocation2 + $0x88] sm:$0xff] %v1570_v0 }
  0xce   : > { %320 = vst [vmem:[#allocation2 + $0x90] sm:$0xff] %v1570_v0  ;;  %321 = vst [vmem:[#allocation2 + $0x98] sm:$0xff] %v1570_v0 }
  0xcf   : > { %322 = vst [vmem:[#allocation2 + $0xa0] sm:$0xff] %v1570_v0  ;;  %323 = vst [vmem:[#allocation2 + $0xa8] sm:$0xff] %v1570_v0 }
  0xd0   : > { %324 = vst [vmem:[#allocation2 + $0xb0] sm:$0xff] %v1570_v0  ;;  %325 = vst [vmem:[#allocation2 + $0xb8] sm:$0xff] %v1570_v0 }
  0xd1   : > { %326 = vst [vmem:[#allocation2 + $0xc0] sm:$0xff] %v1570_v0  ;;  %327 = vst [vmem:[#allocation2 + $0xc8] sm:$0xff] %v1570_v0 }
  0xd2   : > { %328 = vst [vmem:[#allocation2 + $0xd0] sm:$0xff] %v1570_v0  ;;  %329 = vst [vmem:[#allocation2 + $0xd8] sm:$0xff] %v1570_v0 }
  0xd3   : > { %330 = vst [vmem:[#allocation2 + $0xe0] sm:$0xff] %v1570_v0  ;;  %331 = vst [vmem:[#allocation2 + $0xe8] sm:$0xff] %v1570_v0 }
  0xd4   : > { %332 = vst [vmem:[#allocation2 + $0xf0] sm:$0xff] %v1570_v0  ;;  %333 = vst [vmem:[#allocation2 + $0xf8] sm:$0xff] %v1570_v0 }
  0xd5 PF: > { %v399_v1 = vld [vmem:[%s1943_s24 + $0x8] sm:$0xff]  ;;  %v401_v2 = vld [vmem:[%s1943_s24 + $0x18] sm:$0xff]  ;;  %v398_v3 = vld [vmem:[%s1943_s24] sm:$0xff]  ;;  %s2341_s8 = sld [smem:[#allocation18_spill]] }
  0xd6   : > { %v1057_v4 = vpack.c.bf16 %v401_v2, %v399_v1  ;;  %v400_v5 = vld [vmem:[%s1943_s24 + $0x10] sm:$0xff]  ;;  %v403_v6 = vld [vmem:[%s1943_s24 + $0x28] sm:$0xff]  ;;  %v405_v7 = vld [vmem:[%s1943_s24 + $0x38] sm:$0xff] }
  0xd7   : > { %v1059_v8 = vpack.c.bf16 %v400_v5, %v398_v3  ;;  %v1061_v9 = vpack.c.bf16 %v405_v7, %v403_v6  ;;  %v402_v10 = vld [vmem:[%s1943_s24 + $0x20] sm:$0xff]  ;;  %v404_v11 = vld [vmem:[%s1943_s24 + $0x30] sm:$0xff]  ;;  %v407_v12 = vld [vmem:[%s1943_s24 + $0x48] sm:$0xff] }
  0xd8   : > { %1058 = vmatprep.subr.bf16.mxu0 %v1057_v4  ;;  %1121 = vmatprep.subr.bf16.mxu1 %v1057_v4  ;;  %v409_v13 = vld [vmem:[%s1943_s24 + $0x58] sm:$0xff]  ;;  %v1063_v14 = vpack.c.bf16 %v404_v11, %v402_v10  ;;  %v406_v16 = vld [vmem:[%s1943_s24 + $0x40] sm:$0xff]  ;;  %v408_v17 = vld [vmem:[%s1943_s24 + $0x50] sm:$0xff] }
  0xd9   : > { %1060 = vmatpush1.bf16.msra.mxu0 %v1059_v8  ;;  %1137 = vmatpush1.bf16.msra.mxu1 %v1059_v8  ;;  %v1065_v15 = vpack.c.bf16 %v409_v13, %v407_v12  ;;  %v411_v18 = vld [vmem:[%s1943_s24 + $0x68] sm:$0xff]  ;;  %v413_v19 = vld [vmem:[%s1943_s24 + $0x78] sm:$0xff]  ;;  %v1067_v20 = vpack.c.bf16 %v408_v17, %v406_v16  ;;  %v410_v22 = vld [vmem:[%s1943_s24 + $0x60] sm:$0xff] }
  0xda   : > { %1062 = vmatprep.subr.bf16.mxu0 %v1061_v9  ;;  %1122 = vmatprep.subr.bf16.mxu1 %v1061_v9  ;;  %v1069_v21 = vpack.c.bf16 %v413_v19, %v411_v18  ;;  %v412_v23 = vld [vmem:[%s1943_s24 + $0x70] sm:$0xff]  ;;  %v415_v24 = vld [vmem:[%s1943_s24 + $0x88] sm:$0xff]  ;;  %v417_v25 = vld [vmem:[%s1943_s24 + $0x98] sm:$0xff] }
  0xdb   : > { %v1071_v26 = vpack.c.bf16 %v412_v23, %v410_v22  ;;  %v1073_v27 = vpack.c.bf16 %v417_v25, %v415_v24  ;;  %v414_v28 = vld [vmem:[%s1943_s24 + $0x80] sm:$0xff]  ;;  %v416_v29 = vld [vmem:[%s1943_s24 + $0x90] sm:$0xff]  ;;  %v419_v30 = vld [vmem:[%s1943_s24 + $0xa8] sm:$0xff]  ;;  %p1045_p6 = scmp.ne.s32.totalorder %s2341_s8, 3 }
  0xdc   : > { %v421_v31 = vld [vmem:[%s1943_s24 + $0xb8] sm:$0xff]  ;;  %v1075_v32 = vpack.c.bf16 %v416_v29, %v414_v28  ;;  %v418_v34 = vld [vmem:[%s1943_s24 + $0xa0] sm:$0xff]  ;;  %v420_v35 = vld [vmem:[%s1943_s24 + $0xb0] sm:$0xff] }
  0xdd   : > { %1064 = vmatpush1.bf16.msra.mxu0 %v1063_v14  ;;  %1138 = vmatpush1.bf16.msra.mxu1 %v1063_v14  ;;  %v1077_v33 = vpack.c.bf16 %v421_v31, %v419_v30  ;;  %v423_v36 = vld [vmem:[%s1943_s24 + $0xc8] sm:$0xff]  ;;  %v425_v37 = vld [vmem:[%s1943_s24 + $0xd8] sm:$0xff]  ;;  %v1079_v38 = vpack.c.bf16 %v420_v35, %v418_v34  ;;  %v422_v39 = vld [vmem:[%s1943_s24 + $0xc0] sm:$0xff] }
  0xde   : > { %1066 = vmatprep.subr.bf16.mxu0 %v1065_v15  ;;  %1123 = vmatprep.subr.bf16.mxu1 %v1065_v15  ;;  %v1081_v40 = vpack.c.bf16 %v425_v37, %v423_v36  ;;  %v424_v41 = vld [vmem:[%s1943_s24 + $0xd0] sm:$0xff]  ;;  %v367_v42 = vld [vmem:[%s1935_s25 + $0x8] sm:$0xff]  ;;  %v429_v45 = vld [vmem:[%s1943_s24 + $0xf8] sm:$0xff] }
  0xdf   : > { %v383_v43 = vld [vmem:[%s1935_s25 + $0x88] sm:$0xff]  ;;  %526 = vmatprep.mubr.f32.mxu0 %v367_v42  ;;  %v1083_v46 = vpack.c.bf16 %v424_v41, %v422_v39  ;;  %v426_v48 = vld [vmem:[%s1943_s24 + $0xe0] sm:$0xff]  ;;  %v428_v49 = vld [vmem:[%s1943_s24 + $0xf0] sm:$0xff] }
  0xe0   : > { %v427_v44 = vld [vmem:[%s1943_s24 + $0xe8] sm:$0xff]  ;;  %574 = vmatprep.mubr.f32.mxu1 %v383_v43  ;;  %v433_v51 = vld [vmem:[%s1943_s24 + $0x118] sm:$0xff]  ;;  %v1087_v52 = vpack.c.bf16 %v428_v49, %v426_v48  ;;  %v430_v54 = vld [vmem:[%s1943_s24 + $0x100] sm:$0xff] }
  0xe1   : > { %1068 = vmatpush1.bf16.msra.mxu0 %v1067_v20  ;;  %1139 = vmatpush1.bf16.msra.mxu1 %v1067_v20  ;;  %v1085_v47 = vpack.c.bf16 %v429_v45, %v427_v44  ;;  %v431_v50 = vld [vmem:[%s1943_s24 + $0x108] sm:$0xff]  ;;  %v432_v55 = vld [vmem:[%s1943_s24 + $0x110] sm:$0xff]  ;;  %v437_v57 = vld [vmem:[%s1943_s24 + $0x138] sm:$0xff] }
  0xe2   : > { %1070 = vmatprep.subr.bf16.mxu0 %v1069_v21  ;;  %1124 = vmatprep.subr.bf16.mxu1 %v1069_v21  ;;  %v1089_v53 = vpack.c.bf16 %v433_v51, %v431_v50  ;;  %v435_v56 = vld [vmem:[%s1943_s24 + $0x128] sm:$0xff]  ;;  %v1091_v58 = vpack.c.bf16 %v432_v55, %v430_v54  ;;  %v434_v60 = vld [vmem:[%s1943_s24 + $0x120] sm:$0xff]  ;;  %v436_v61 = vld [vmem:[%s1943_s24 + $0x130] sm:$0xff] }
  0xe3   : > { %v1093_v59 = vpack.c.bf16 %v437_v57, %v435_v56  ;;  %v439_v62 = vld [vmem:[%s1943_s24 + $0x148] sm:$0xff]  ;;  %v441_v63 = vld [vmem:[%s1943_s24 + $0x158] sm:$0xff]  ;;  %v1095_v0 = vpack.c.bf16 %v436_v61, %v434_v60  ;;  %v438_v2 = vld [vmem:[%s1943_s24 + $0x140] sm:$0xff] }
  0xe4   : > { %v1097_v1 = vpack.c.bf16 %v441_v63, %v439_v62  ;;  %v440_v3 = vld [vmem:[%s1943_s24 + $0x150] sm:$0xff]  ;;  %v443_v4 = vld [vmem:[%s1943_s24 + $0x168] sm:$0xff]  ;;  %v445_v5 = vld [vmem:[%s1943_s24 + $0x178] sm:$0xff] }
  0xe5   : > { %1072 = vmatpush1.bf16.msra.mxu0 %v1071_v26  ;;  %1140 = vmatpush1.bf16.msra.mxu1 %v1071_v26  ;;  %v1099_v6 = vpack.c.bf16 %v440_v3, %v438_v2  ;;  %v1101_v7 = vpack.c.bf16 %v445_v5, %v443_v4  ;;  %v442_v8 = vld [vmem:[%s1943_s24 + $0x160] sm:$0xff]  ;;  %v444_v9 = vld [vmem:[%s1943_s24 + $0x170] sm:$0xff]  ;;  %v447_v10 = vld [vmem:[%s1943_s24 + $0x188] sm:$0xff] }
  0xe6   : > { %1074 = vmatprep.subr.bf16.mxu0 %v1073_v27  ;;  %1125 = vmatprep.subr.bf16.mxu1 %v1073_v27  ;;  %v449_v11 = vld [vmem:[%s1943_s24 + $0x198] sm:$0xff]  ;;  %v1103_v12 = vpack.c.bf16 %v444_v9, %v442_v8  ;;  %v446_v14 = vld [vmem:[%s1943_s24 + $0x180] sm:$0xff]  ;;  %v448_v15 = vld [vmem:[%s1943_s24 + $0x190] sm:$0xff] }
  0xe7   : > { %v1105_v13 = vpack.c.bf16 %v449_v11, %v447_v10  ;;  %v451_v16 = vld [vmem:[%s1943_s24 + $0x1a8] sm:$0xff]  ;;  %v453_v17 = vld [vmem:[%s1943_s24 + $0x1b8] sm:$0xff]  ;;  %v1107_v18 = vpack.c.bf16 %v448_v15, %v446_v14  ;;  %v450_v20 = vld [vmem:[%s1943_s24 + $0x1a0] sm:$0xff] }
  0xe8   : > { %v1109_v19 = vpack.c.bf16 %v453_v17, %v451_v16  ;;  %v452_v21 = vld [vmem:[%s1943_s24 + $0x1b0] sm:$0xff]  ;;  %v455_v22 = vld [vmem:[%s1943_s24 + $0x1c8] sm:$0xff]  ;;  %v457_v23 = vld [vmem:[%s1943_s24 + $0x1d8] sm:$0xff] }
  0xe9   : > { %1076 = vmatpush1.bf16.msra.mxu0 %v1075_v32  ;;  %1141 = vmatpush1.bf16.msra.mxu1 %v1075_v32  ;;  %v1111_v24 = vpack.c.bf16 %v452_v21, %v450_v20  ;;  %v1113_v25 = vpack.c.bf16 %v457_v23, %v455_v22  ;;  %v454_v26 = vld [vmem:[%s1943_s24 + $0x1c0] sm:$0xff]  ;;  %v456_v27 = vld [vmem:[%s1943_s24 + $0x1d0] sm:$0xff]  ;;  %v459_v28 = vld [vmem:[%s1943_s24 + $0x1e8] sm:$0xff] }
  0xea   : > { %1078 = vmatprep.subr.bf16.mxu0 %v1077_v33  ;;  %1126 = vmatprep.subr.bf16.mxu1 %v1077_v33  ;;  %v461_v29 = vld [vmem:[%s1943_s24 + $0x1f8] sm:$0xff]  ;;  %v1115_v30 = vpack.c.bf16 %v456_v27, %v454_v26  ;;  %v458_v32 = vld [vmem:[%s1943_s24 + $0x1e0] sm:$0xff]  ;;  %v460_v33 = vld [vmem:[%s1943_s24 + $0x1f0] sm:$0xff] }
  0xeb   : > { %v1117_v31 = vpack.c.bf16 %v461_v29, %v459_v28  ;;  %v1119_v34 = vpack.c.bf16 %v460_v33, %v458_v32  ;;  %v366_v35 = vld [vmem:[%s1935_s25] sm:$0xff]  ;;  %v369_v37 = vld [vmem:[%s1935_s25 + $0x18] sm:$0xff]  ;;  %v368_v39 = vld [vmem:[%s1935_s25 + $0x10] sm:$0xff] }
  0xec   : > { %v382_v36 = vld [vmem:[%s1935_s25 + $0x80] sm:$0xff]  ;;  %v371_v41 = vld [vmem:[%s1935_s25 + $0x28] sm:$0xff]  ;;  %v373_v45 = vld [vmem:[%s1935_s25 + $0x38] sm:$0xff] }
  0xed   : > { %1080 = vmatpush1.bf16.msra.mxu0 %v1079_v38  ;;  %1142 = vmatpush1.bf16.msra.mxu1 %v1079_v38  ;;  %v385_v38 = vld [vmem:[%s1935_s25 + $0x98] sm:$0xff]  ;;  %v387_v42 = vld [vmem:[%s1935_s25 + $0xa8] sm:$0xff]  ;;  %v370_v43 = vld [vmem:[%s1935_s25 + $0x20] sm:$0xff] }
  0xee   : > { %1082 = vmatprep.subr.bf16.mxu0 %v1081_v40  ;;  %1127 = vmatprep.subr.bf16.mxu1 %v1081_v40  ;;  %v384_v40 = vld [vmem:[%s1935_s25 + $0x90] sm:$0xff]  ;;  %v386_v44 = vld [vmem:[%s1935_s25 + $0xa0] sm:$0xff]  ;;  %v375_v49 = vld [vmem:[%s1935_s25 + $0x48] sm:$0xff] }
  0xef   : > { %v388_v48 = vld [vmem:[%s1935_s25 + $0xb0] sm:$0xff]  ;;  %v391_v50 = vld [vmem:[%s1935_s25 + $0xc8] sm:$0xff]  ;;  %v374_v51 = vld [vmem:[%s1935_s25 + $0x40] sm:$0xff] }
  0xf0   : > { %v393_v54 = vld [vmem:[%s1935_s25 + $0xd8] sm:$0xff]  ;;  %v376_v55 = vld [vmem:[%s1935_s25 + $0x50] sm:$0xff]  ;;  %v379_v57 = vld [vmem:[%s1935_s25 + $0x68] sm:$0xff] }
  0xf1   : > { %1084 = vmatpush1.bf16.msra.mxu0 %v1083_v46  ;;  %1143 = vmatpush1.bf16.msra.mxu1 %v1083_v46  ;;  %v389_v46 = vld [vmem:[%s1935_s25 + $0xb8] sm:$0xff]  ;;  %v392_v56 = vld [vmem:[%s1935_s25 + $0xd0] sm:$0xff]  ;;  %v394_v60 = vld [vmem:[%s1935_s25 + $0xe0] sm:$0xff] }
  0xf2   : > { %1086 = vmatprep.subr.bf16.mxu0 %v1085_v47  ;;  %1128 = vmatprep.subr.bf16.mxu1 %v1085_v47  ;;  %v372_v47 = vld [vmem:[%s1935_s25 + $0x30] sm:$0xff]  ;;  %v381_v61 = vld [vmem:[%s1935_s25 + $0x78] sm:$0xff]  ;;  %v350_v2 = vld [vmem:[#allocation2 + $0x80] sm:$0xff] }
  0xf3   : > { %v397_v62 = vld [vmem:[%s1935_s25 + $0xf8] sm:$0xff]  ;;  %v380_v63 = vld [vmem:[%s1935_s25 + $0x70] sm:$0xff]  ;;  %v335_v3 = vld [vmem:[#allocation2 + $0x8] sm:$0xff] }
  0xf4   : > { %v351_v4 = vld [vmem:[#allocation2 + $0x88] sm:$0xff]  ;;  %v352_v14 = vld [vmem:[#allocation2 + $0x90] sm:$0xff]  ;;  %v337_v15 = vld [vmem:[#allocation2 + $0x18] sm:$0xff] }
  0xf5   : > { %1088 = vmatpush1.bf16.msra.mxu0 %v1087_v52  ;;  %1144 = vmatpush1.bf16.msra.mxu1 %v1087_v52  ;;  %v390_v52 = vld [vmem:[%s1935_s25 + $0xc0] sm:$0xff]  ;;  %v353_v16 = vld [vmem:[#allocation2 + $0x98] sm:$0xff]  ;;  %v339_v27 = vld [vmem:[#allocation2 + $0x28] sm:$0xff] }
  0xf6   : > { %1090 = vmatprep.subr.bf16.mxu0 %v1089_v53  ;;  %1129 = vmatprep.subr.bf16.mxu1 %v1089_v53  ;;  %v377_v53 = vld [vmem:[%s1935_s25 + $0x58] sm:$0xff]  ;;  %v354_v26 = vld [vmem:[#allocation2 + $0xa0] sm:$0xff]  ;;  %v355_v28 = vld [vmem:[#allocation2 + $0xa8] sm:$0xff] }
  0xf9   : > { %1092 = vmatpush1.bf16.msra.mxu0 %v1091_v58  ;;  %1145 = vmatpush1.bf16.msra.mxu1 %v1091_v58  ;;  %v395_v58 = vld [vmem:[%s1935_s25 + $0xe8] sm:$0xff] }
  0xfa   : > { %1094 = vmatprep.subr.bf16.mxu0 %v1093_v59  ;;  %1130 = vmatprep.subr.bf16.mxu1 %v1093_v59  ;;  %v378_v59 = vld [vmem:[%s1935_s25 + $0x60] sm:$0xff] }
  0xfd   : > { %1096 = vmatpush1.bf16.msra.mxu0 %v1095_v0  ;;  %1146 = vmatpush1.bf16.msra.mxu1 %v1095_v0  ;;  %v396_v0 = vld [vmem:[%s1935_s25 + $0xf0] sm:$0xff] }
  0xfe   : > { %1098 = vmatprep.subr.bf16.mxu0 %v1097_v1  ;;  %1131 = vmatprep.subr.bf16.mxu1 %v1097_v1  ;;  %v334_v1 = vld [vmem:[#allocation2] sm:$0xff] }
 0x101   : > { %1100 = vmatpush1.bf16.msra.mxu0 %v1099_v6  ;;  %1147 = vmatpush1.bf16.msra.mxu1 %v1099_v6 }
 0x102   : > { %1102 = vmatprep.subr.bf16.mxu0 %v1101_v7  ;;  %1132 = vmatprep.subr.bf16.mxu1 %v1101_v7 }
 0x105   : > { %1104 = vmatpush1.bf16.msra.mxu0 %v1103_v12  ;;  %1148 = vmatpush1.bf16.msra.mxu1 %v1103_v12 }
 0x106   : > { %1106 = vmatprep.subr.bf16.mxu0 %v1105_v13  ;;  %1133 = vmatprep.subr.bf16.mxu1 %v1105_v13  ;;  %v336_v13 = vld [vmem:[#allocation2 + $0x10] sm:$0xff] }
 0x109   : > { %1108 = vmatpush1.bf16.msra.mxu0 %v1107_v18  ;;  %1149 = vmatpush1.bf16.msra.mxu1 %v1107_v18 }
 0x10a   : > { %1110 = vmatprep.subr.bf16.mxu0 %v1109_v19  ;;  %1134 = vmatprep.subr.bf16.mxu1 %v1109_v19 }
 0x10d   : > { %1112 = vmatpush1.bf16.msra.mxu0 %v1111_v24  ;;  %1150 = vmatpush1.bf16.msra.mxu1 %v1111_v24 }
 0x10e   : > { %1114 = vmatprep.subr.bf16.mxu0 %v1113_v25  ;;  %1135 = vmatprep.subr.bf16.mxu1 %v1113_v25  ;;  %v338_v25 = vld [vmem:[#allocation2 + $0x20] sm:$0xff] }
 0x111   : > { %1116 = vmatpush1.bf16.msra.mxu0 %v1115_v30  ;;  %1151 = vmatpush1.bf16.msra.mxu1 %v1115_v30 }
 0x112   : > { %1118 = vmatprep.subr.bf16.mxu0 %v1117_v31  ;;  %1136 = vmatprep.subr.bf16.mxu1 %v1117_v31 }
 0x115   : > { %1120 = vmatpush1.bf16.msra.mxu0 %v1119_v34  ;;  %1152 = vmatpush1.bf16.msra.mxu1 %v1119_v34 }
 0x118   : > { %527 = vmatmul.mubr.f32.vlgmr.msra.gmra.mrb[0].mxu0 %v366_v35  ;;  %575 = vmatmul.mubr.f32.vlgmr.msra.gmra.mrb[0].mxu1 %v382_v36 }
 0x119   : > { %532 = vmatprep.mubr.f32.mxu0 %v369_v37  ;;  %580 = vmatprep.mubr.f32.mxu1 %v385_v38  ;;  %v340_v37 = vld [vmem:[#allocation2 + $0x30] sm:$0xff] }
 0x11a   : > { %v356_v38 = vld [vmem:[#allocation2 + $0xb0] sm:$0xff] }
 0x11c   : > { %533 = vmatmul.mubr.f32.gmra.mrb[2].mxu0 %v368_v39  ;;  %581 = vmatmul.mubr.f32.gmra.mrb[2].mxu1 %v384_v40  ;;  %v341_v39 = vld [vmem:[#allocation2 + $0x38] sm:$0xff] }
 0x11d   : > { %538 = vmatprep.mubr.f32.mxu0 %v371_v41  ;;  %586 = vmatprep.mubr.f32.mxu1 %v387_v42  ;;  %v357_v40 = vld [vmem:[#allocation2 + $0xb8] sm:$0xff] }
 0x120   : > { %539 = vmatmul.mubr.f32.gmra.mrb[4].mxu0 %v370_v43  ;;  %587 = vmatmul.mubr.f32.gmra.mrb[4].mxu1 %v386_v44 }
 0x121   : > { %544 = vmatprep.mubr.f32.mxu0 %v373_v45  ;;  %592 = vmatprep.mubr.f32.mxu1 %v389_v46 }
 0x124   : > { %545 = vmatmul.mubr.f32.gmra.mrb[6].mxu0 %v372_v47  ;;  %593 = vmatmul.mubr.f32.gmra.mrb[6].mxu1 %v388_v48 }
 0x125   : > { %550 = vmatprep.mubr.f32.mxu0 %v375_v49  ;;  %598 = vmatprep.mubr.f32.mxu1 %v391_v50  ;;  %v342_v49 = vld [vmem:[#allocation2 + $0x40] sm:$0xff] }
 0x126   : > { %v358_v50 = vld [vmem:[#allocation2 + $0xc0] sm:$0xff] }
 0x128   : > { %551 = vmatmul.mubr.f32.gmra.mrb[8].mxu0 %v374_v51  ;;  %599 = vmatmul.mubr.f32.gmra.mrb[8].mxu1 %v390_v52  ;;  %v343_v51 = vld [vmem:[#allocation2 + $0x48] sm:$0xff] }
 0x129   : > { %556 = vmatprep.mubr.f32.mxu0 %v377_v53  ;;  %604 = vmatprep.mubr.f32.mxu1 %v393_v54  ;;  %v359_v52 = vld [vmem:[#allocation2 + $0xc8] sm:$0xff] }
 0x12c   : > { %557 = vmatmul.mubr.f32.gmra.mrb[10].mxu0 %v376_v55  ;;  %605 = vmatmul.mubr.f32.gmra.mrb[10].mxu1 %v392_v56 }
 0x12d   : > { %562 = vmatprep.mubr.f32.mxu0 %v379_v57  ;;  %610 = vmatprep.mubr.f32.mxu1 %v395_v58 }
 0x130   : > { %563 = vmatmul.mubr.f32.gmra.mrb[12].mxu0 %v378_v59  ;;  %611 = vmatmul.mubr.f32.gmra.mrb[12].mxu1 %v394_v60 }
 0x131   : > { %568 = vmatprep.mubr.f32.mxu0 %v381_v61  ;;  %616 = vmatprep.mubr.f32.mxu1 %v397_v62  ;;  %v344_v61 = vld [vmem:[#allocation2 + $0x50] sm:$0xff] }
 0x132   : > { %v360_v62 = vld [vmem:[#allocation2 + $0xd0] sm:$0xff] }
 0x134   : > { %569 = vmatmul.mubr.f32.gmra.mrb[14].mxu0 %v380_v63  ;;  %617 = vmatmul.mubr.f32.gmra.mrb[14].mxu1 %v396_v0  ;;  %v345_v63 = vld [vmem:[#allocation2 + $0x58] sm:$0xff] }
 0x135   : > { %v361_v0 = vld [vmem:[#allocation2 + $0xd8] sm:$0xff] }
 0x1eb   : > { %v528_v5 = vpop.f32.mrb[0].mxu0  ;;  %v576_v6 = vpop.f32.mrb[0].mxu1 }
 0x1ec   : > { %v623_v7 = vadd.f32 %v528_v5, %v334_v1  ;;  %v639_v8 = vadd.f32 %v576_v6, %v350_v2  ;;  %v530_v9 = vpop.f32.mrb[1].mxu0  ;;  %v578_v10 = vpop.f32.mrb[1].mxu1 }
 0x1ed   : > { %v624_v11 = vadd.f32 %v530_v9, %v335_v3  ;;  %v640_v12 = vadd.f32 %v578_v10, %v351_v4  ;;  %v346_v9 = vld [vmem:[#allocation2 + $0x60] sm:$0xff] }
 0x1ee   : > { %655 = vst [vmem:[#allocation2] sm:$0xff] %v623_v7  ;;  %671 = vst [vmem:[#allocation2 + $0x80] sm:$0xff] %v639_v8  ;;  %v362_v10 = vld [vmem:[#allocation2 + $0xe0] sm:$0xff] }
 0x1ef   : > { %656 = vst [vmem:[#allocation2 + $0x8] sm:$0xff] %v624_v11  ;;  %672 = vst [vmem:[#allocation2 + $0x88] sm:$0xff] %v640_v12  ;;  %v534_v17 = vpop.f32.mrb[2].mxu0  ;;  %v582_v18 = vpop.f32.mrb[2].mxu1  ;;  %v347_v11 = vld [vmem:[#allocation2 + $0x68] sm:$0xff] }
 0x1f0   : > { %v625_v19 = vadd.f32 %v534_v17, %v336_v13  ;;  %v641_v20 = vadd.f32 %v582_v18, %v352_v14  ;;  %v536_v21 = vpop.f32.mrb[3].mxu0  ;;  %v584_v22 = vpop.f32.mrb[3].mxu1  ;;  %v363_v12 = vld [vmem:[#allocation2 + $0xe8] sm:$0xff] }
 0x1f1   : > { %v626_v23 = vadd.f32 %v536_v21, %v337_v15  ;;  %v642_v24 = vadd.f32 %v584_v22, %v353_v16  ;;  %v348_v21 = vld [vmem:[#allocation2 + $0x70] sm:$0xff] }
 0x1f2   : > { %657 = vst [vmem:[#allocation2 + $0x10] sm:$0xff] %v625_v19  ;;  %673 = vst [vmem:[#allocation2 + $0x90] sm:$0xff] %v641_v20  ;;  %v364_v22 = vld [vmem:[#allocation2 + $0xf0] sm:$0xff] }
 0x1f3   : > { %658 = vst [vmem:[#allocation2 + $0x18] sm:$0xff] %v626_v23  ;;  %674 = vst [vmem:[#allocation2 + $0x98] sm:$0xff] %v642_v24  ;;  %v540_v29 = vpop.f32.mrb[4].mxu0  ;;  %v588_v30 = vpop.f32.mrb[4].mxu1  ;;  %v349_v23 = vld [vmem:[#allocation2 + $0x78] sm:$0xff] }
 0x1f4   : > { %v627_v31 = vadd.f32 %v540_v29, %v338_v25  ;;  %v643_v32 = vadd.f32 %v588_v30, %v354_v26  ;;  %v542_v33 = vpop.f32.mrb[5].mxu0  ;;  %v590_v34 = vpop.f32.mrb[5].mxu1  ;;  %v365_v24 = vld [vmem:[#allocation2 + $0xf8] sm:$0xff] }
 0x1f5   : > { %v628_v35 = vadd.f32 %v542_v33, %v339_v27  ;;  %v644_v36 = vadd.f32 %v590_v34, %v355_v28  ;;  %v725_v33 = vlaneseq (!%p1045_p6)  ;;  %v723_v34 = vld [vmem:[%s259_s15] sm:$0x3] (!%p1045_p6) }
 0x1f6   : > { %659 = vst [vmem:[#allocation2 + $0x20] sm:$0xff] %v627_v31  ;;  %675 = vst [vmem:[#allocation2 + $0xa0] sm:$0xff] %v643_v32 }
 0x1f7   : > { %660 = vst [vmem:[#allocation2 + $0x28] sm:$0xff] %v628_v35  ;;  %676 = vst [vmem:[#allocation2 + $0xa8] sm:$0xff] %v644_v36  ;;  %v546_v41 = vpop.f32.mrb[6].mxu0  ;;  %v594_v42 = vpop.f32.mrb[6].mxu1  ;;  %v726_v35 = vshrl.u32 (!%p1045_p6), %v725_v33, 7  ;;  %v691_v36 = vld [vmem:[#allocation2] sm:$0xff] (!%p1045_p6) }
 0x1f8   : > { %v629_v43 = vadd.f32 %v546_v41, %v340_v37  ;;  %v645_v44 = vadd.f32 %v594_v42, %v356_v38  ;;  %v548_v45 = vpop.f32.mrb[7].mxu0  ;;  %v596_v46 = vpop.f32.mrb[7].mxu1  ;;  %v692_v37 = vld [vmem:[#allocation2 + $0x8] sm:$0xff] (!%p1045_p6) }
 0x1f9   : > { %v630_v47 = vadd.f32 %v548_v45, %v341_v39  ;;  %v646_v48 = vadd.f32 %v596_v46, %v357_v40  ;;  %v693_v38 = vld [vmem:[#allocation2 + $0x10] sm:$0xff] (!%p1045_p6)  ;;  %v727_v40 = vsub.s32 (!%p1045_p6), 0, %v726_v35  ;;  %v731_v41 = vsub.s32 (!%p1045_p6), 1, %v726_v35 }
 0x1fa   : > { %661 = vst [vmem:[#allocation2 + $0x30] sm:$0xff] %v629_v43  ;;  %677 = vst [vmem:[#allocation2 + $0xb0] sm:$0xff] %v645_v44  ;;  %v694_v39 = vld [vmem:[#allocation2 + $0x18] sm:$0xff] (!%p1045_p6) }
 0x1fb   : > { %662 = vst [vmem:[#allocation2 + $0x38] sm:$0xff] %v630_v47  ;;  %678 = vst [vmem:[#allocation2 + $0xb8] sm:$0xff] %v646_v48  ;;  %v552_v53 = vpop.f32.mrb[8].mxu0  ;;  %v600_v54 = vpop.f32.mrb[8].mxu1 }
 0x1fc   : > { %v631_v55 = vadd.f32 %v552_v53, %v342_v49  ;;  %v647_v56 = vadd.f32 %v600_v54, %v358_v50  ;;  %v554_v57 = vpop.f32.mrb[9].mxu0  ;;  %v602_v58 = vpop.f32.mrb[9].mxu1  ;;  %v2060_v49 = vrot.slane (!%p1045_p6), %v723_v34, %v727_v40  ;;  %v2062_v50 = vrot.slane (!%p1045_p6), %v723_v34, %v731_v41 }
 0x1fd   : > { %v632_v59 = vadd.f32 %v554_v57, %v343_v51  ;;  %v648_v60 = vadd.f32 %v602_v58, %v359_v52  ;;  %v695_v42 = vld [vmem:[#allocation2 + $0x20] sm:$0xff] (!%p1045_p6) }
 0x1fe   : > { %663 = vst [vmem:[#allocation2 + $0x40] sm:$0xff] %v631_v55  ;;  %679 = vst [vmem:[#allocation2 + $0xc0] sm:$0xff] %v647_v56  ;;  %v696_v43 = vld [vmem:[#allocation2 + $0x28] sm:$0xff] (!%p1045_p6)  ;;  %v707_v56 = vld [vmem:[#allocation2 + $0x80] sm:$0xff] (!%p1045_p6)  ;;  %v735_v57 = vadd.f32 (!%p1045_p6), %v2060_v49, %v691_v36  ;;  %v736_v58 = vadd.f32 (!%p1045_p6), %v2062_v50, %v692_v37 }
 0x1ff   : > { %664 = vst [vmem:[#allocation2 + $0x48] sm:$0xff] %v632_v59  ;;  %680 = vst [vmem:[#allocation2 + $0xc8] sm:$0xff] %v648_v60  ;;  %v558_v1 = vpop.f32.mrb[10].mxu0  ;;  %v606_v2 = vpop.f32.mrb[10].mxu1  ;;  %v737_v59 = vadd.f32 (!%p1045_p6), %v2060_v49, %v693_v38  ;;  %v738_v60 = vadd.f32 (!%p1045_p6), %v2062_v50, %v694_v39 }
 0x200   : > { %v633_v3 = vadd.f32 %v558_v1, %v344_v61  ;;  %v649_v4 = vadd.f32 %v606_v2, %v360_v62  ;;  %v560_v5 = vpop.f32.mrb[11].mxu0  ;;  %v608_v6 = vpop.f32.mrb[11].mxu1  ;;  %v708_v61 = vld [vmem:[#allocation2 + $0x88] sm:$0xff] (!%p1045_p6)  ;;  %v709_v62 = vld [vmem:[#allocation2 + $0x90] sm:$0xff] (!%p1045_p6)  ;;  %v740_v1 = vadd.f32 (!%p1045_p6), %v2062_v50, %v696_v43  ;;  %767 = vst [vmem:[%s1958_s9] sm:$0xff] (!%p1045_p6), %v735_v57  ;;  %768 = vst [vmem:[%s1958_s9 + $0x8] sm:$0xff] (!%p1045_p6), %v736_v58 }
 0x201   : > { %v634_v7 = vadd.f32 %v560_v5, %v345_v63  ;;  %v650_v8 = vadd.f32 %v608_v6, %v361_v0  ;;  %v697_v44 = vld [vmem:[#allocation2 + $0x30] sm:$0xff] (!%p1045_p6)  ;;  %v710_v63 = vld [vmem:[#allocation2 + $0x98] sm:$0xff] (!%p1045_p6)  ;;  %v739_v0 = vadd.f32 (!%p1045_p6), %v2060_v49, %v695_v42  ;;  %v712_v5 = vld [vmem:[#allocation2 + $0xa8] sm:$0xff] (!%p1045_p6)  ;;  %769 = vst [vmem:[%s1958_s9 + $0x10] sm:$0xff] (!%p1045_p6), %v737_v59 }
 0x202   : > { %665 = vst [vmem:[#allocation2 + $0x50] sm:$0xff] %v633_v3  ;;  %681 = vst [vmem:[#allocation2 + $0xd0] sm:$0xff] %v649_v4  ;;  %v698_v45 = vld [vmem:[#allocation2 + $0x38] sm:$0xff] (!%p1045_p6)  ;;  %v741_v2 = vadd.f32 (!%p1045_p6), %v2060_v49, %v697_v44  ;;  %v711_v4 = vld [vmem:[#allocation2 + $0xa0] sm:$0xff] (!%p1045_p6) }
 0x203   : > { %666 = vst [vmem:[#allocation2 + $0x58] sm:$0xff] %v634_v7  ;;  %682 = vst [vmem:[#allocation2 + $0xd8] sm:$0xff] %v650_v8  ;;  %v564_v13 = vpop.f32.mrb[12].mxu0  ;;  %v612_v14 = vpop.f32.mrb[12].mxu1  ;;  %v742_v3 = vadd.f32 (!%p1045_p6), %v2062_v50, %v698_v45  ;;  %v713_v6 = vld [vmem:[#allocation2 + $0xb0] sm:$0xff] (!%p1045_p6) }
 0x204   : > { %v635_v15 = vadd.f32 %v564_v13, %v346_v9  ;;  %v651_v16 = vadd.f32 %v612_v14, %v362_v10  ;;  %v566_v17 = vpop.f32.mrb[13].mxu0  ;;  %v614_v18 = vpop.f32.mrb[13].mxu1  ;;  %770 = vst [vmem:[%s1958_s9 + $0x18] sm:$0xff] (!%p1045_p6), %v738_v60  ;;  %771 = vst [vmem:[%s1958_s9 + $0x20] sm:$0xff] (!%p1045_p6), %v739_v0 }
 0x205   : > { %v636_v19 = vadd.f32 %v566_v17, %v347_v11  ;;  %v652_v20 = vadd.f32 %v614_v18, %v363_v12  ;;  %690 = sbr.rel (%p1045_p6) target bundleno = 535 (0x217), region = 52  ;;  %v699_v46 = vld [vmem:[#allocation2 + $0x40] sm:$0xff] (!%p1045_p6)  ;;  %v714_v11 = vld [vmem:[#allocation2 + $0xb8] sm:$0xff] (!%p1045_p6)  ;;  %772 = vst [vmem:[%s1958_s9 + $0x28] sm:$0xff] (!%p1045_p6), %v740_v1  ;;  %773 = vst [vmem:[%s1958_s9 + $0x30] sm:$0xff] (!%p1045_p6), %v741_v2 }
 0x206   : > { %667 = vst [vmem:[#allocation2 + $0x60] sm:$0xff] %v635_v15  ;;  %683 = vst [vmem:[#allocation2 + $0xe0] sm:$0xff] %v651_v16  ;;  %v700_v47 = vld [vmem:[#allocation2 + $0x48] sm:$0xff] (!%p1045_p6)  ;;  %v743_v7 = vadd.f32 (!%p1045_p6), %v2060_v49, %v699_v46  ;;  %v715_v12 = vld [vmem:[#allocation2 + $0xc0] sm:$0xff] (!%p1045_p6) }
 0x207   : > { %668 = vst [vmem:[#allocation2 + $0x68] sm:$0xff] %v636_v19  ;;  %684 = vst [vmem:[#allocation2 + $0xe8] sm:$0xff] %v652_v20  ;;  %v570_v25 = vpop.f32.mrb[14].mxu0  ;;  %v618_v26 = vpop.f32.mrb[14].mxu1  ;;  %v744_v8 = vadd.f32 (!%p1045_p6), %v2062_v50, %v700_v47  ;;  %v716_v13 = vld [vmem:[#allocation2 + $0xc8] sm:$0xff] (!%p1045_p6) }
 0x208   : > { %v637_v27 = vadd.f32 %v570_v25, %v348_v21  ;;  %v653_v28 = vadd.f32 %v618_v26, %v364_v22  ;;  %v572_v29 = vpop.f32.mrb[15].mxu0  ;;  %v620_v30 = vpop.f32.mrb[15].mxu1  ;;  %774 = vst [vmem:[%s1958_s9 + $0x38] sm:$0xff] (!%p1045_p6), %v742_v3  ;;  %775 = vst [vmem:[%s1958_s9 + $0x40] sm:$0xff] (!%p1045_p6), %v743_v7  ;;  %v751_v21 = vadd.f32 (!%p1045_p6), %v2060_v49, %v707_v56 }
 0x209   : > { %v638_v31 = vadd.f32 %v572_v29, %v349_v23  ;;  %v654_v32 = vadd.f32 %v620_v30, %v365_v24  ;;  %v701_v48 = vld [vmem:[#allocation2 + $0x50] sm:$0xff] (!%p1045_p6)  ;;  %776 = vst [vmem:[%s1958_s9 + $0x48] sm:$0xff] (!%p1045_p6), %v744_v8  ;;  %v752_v22 = vadd.f32 (!%p1045_p6), %v2062_v50, %v708_v61  ;;  %v753_v23 = vadd.f32 (!%p1045_p6), %v2060_v49, %v709_v62 }
 0x20a   : > { %669 = vst [vmem:[#allocation2 + $0x70] sm:$0xff] %v637_v27  ;;  %685 = vst [vmem:[#allocation2 + $0xf0] sm:$0xff] %v653_v28  ;;  %v702_v51 = vld [vmem:[#allocation2 + $0x58] sm:$0xff] (!%p1045_p6)  ;;  %v745_v9 = vadd.f32 (!%p1045_p6), %v2060_v49, %v701_v48  ;;  %v717_v18 = vld [vmem:[#allocation2 + $0xd0] sm:$0xff] (!%p1045_p6)  ;;  %v754_v24 = vadd.f32 (!%p1045_p6), %v2062_v50, %v710_v63  ;;  %v755_v28 = vadd.f32 (!%p1045_p6), %v2060_v49, %v711_v4 }
 0x20b   : > { %670 = vst [vmem:[#allocation2 + $0x78] sm:$0xff] %v638_v31  ;;  %686 = vst [vmem:[#allocation2 + $0xf8] sm:$0xff] %v654_v32  ;;  %v746_v10 = vadd.f32 (!%p1045_p6), %v2062_v50, %v702_v51  ;;  %v718_v19 = vld [vmem:[#allocation2 + $0xd8] sm:$0xff] (!%p1045_p6)  ;;  %v756_v29 = vadd.f32 (!%p1045_p6), %v2062_v50, %v712_v5  ;;  %v757_v30 = vadd.f32 (!%p1045_p6), %v2060_v49, %v713_v6 }
 0x20c   : > { %777 = vst [vmem:[%s1958_s9 + $0x50] sm:$0xff] %v745_v9  ;;  %v758_v31 = vadd.f32 %v2062_v50, %v714_v11  ;;  %783 = vst [vmem:[%s1958_s9 + $0x80] sm:$0xff] %v751_v21  ;;  %v759_v32 = vadd.f32 %v2060_v49, %v715_v12  ;;  %v760_v33 = vadd.f32 %v2062_v50, %v716_v13 }
 0x20d   : > { %v703_v52 = vld [vmem:[#allocation2 + $0x60] sm:$0xff]  ;;  %778 = vst [vmem:[%s1958_s9 + $0x58] sm:$0xff] %v746_v10  ;;  %784 = vst [vmem:[%s1958_s9 + $0x88] sm:$0xff] %v752_v22  ;;  %v761_v34 = vadd.f32 %v2060_v49, %v717_v18  ;;  %v762_v35 = vadd.f32 %v2062_v50, %v718_v19 }
 0x20e   : > { %v704_v53 = vld [vmem:[#allocation2 + $0x68] sm:$0xff]  ;;  %v747_v14 = vadd.f32 %v2060_v49, %v703_v52  ;;  %v719_v20 = vld [vmem:[#allocation2 + $0xe0] sm:$0xff]  ;;  %785 = vst [vmem:[%s1958_s9 + $0x90] sm:$0xff] %v753_v23  ;;  %786 = vst [vmem:[%s1958_s9 + $0x98] sm:$0xff] %v754_v24 }
 0x20f   : > { %v748_v15 = vadd.f32 %v2062_v50, %v704_v53  ;;  %v720_v25 = vld [vmem:[#allocation2 + $0xe8] sm:$0xff]  ;;  %787 = vst [vmem:[%s1958_s9 + $0xa0] sm:$0xff] %v755_v28  ;;  %788 = vst [vmem:[%s1958_s9 + $0xa8] sm:$0xff] %v756_v29  ;;  %v763_v36 = vadd.f32 %v2060_v49, %v719_v20 }
 0x210   : > { %779 = vst [vmem:[%s1958_s9 + $0x60] sm:$0xff] %v747_v14  ;;  %789 = vst [vmem:[%s1958_s9 + $0xb0] sm:$0xff] %v757_v30  ;;  %v764_v37 = vadd.f32 %v2062_v50, %v720_v25 }
 0x211   : > { %v705_v54 = vld [vmem:[#allocation2 + $0x70] sm:$0xff]  ;;  %780 = vst [vmem:[%s1958_s9 + $0x68] sm:$0xff] %v748_v15  ;;  %790 = vst [vmem:[%s1958_s9 + $0xb8] sm:$0xff] %v758_v31 }
 0x212   : > { %v706_v55 = vld [vmem:[#allocation2 + $0x78] sm:$0xff]  ;;  %v749_v16 = vadd.f32 %v2060_v49, %v705_v54  ;;  %v721_v26 = vld [vmem:[#allocation2 + $0xf0] sm:$0xff]  ;;  %791 = vst [vmem:[%s1958_s9 + $0xc0] sm:$0xff] %v759_v32  ;;  %792 = vst [vmem:[%s1958_s9 + $0xc8] sm:$0xff] %v760_v33 }
 0x213   : > { %v750_v17 = vadd.f32 %v2062_v50, %v706_v55  ;;  %v722_v27 = vld [vmem:[#allocation2 + $0xf8] sm:$0xff]  ;;  %v765_v38 = vadd.f32 %v2060_v49, %v721_v26  ;;  %793 = vst [vmem:[%s1958_s9 + $0xd0] sm:$0xff] %v761_v34  ;;  %794 = vst [vmem:[%s1958_s9 + $0xd8] sm:$0xff] %v762_v35 }
 0x214   : > { %781 = vst [vmem:[%s1958_s9 + $0x70] sm:$0xff] %v749_v16  ;;  %v766_v39 = vadd.f32 %v2062_v50, %v722_v27  ;;  %795 = vst [vmem:[%s1958_s9 + $0xe0] sm:$0xff] %v763_v36 }
 0x215   : > { %782 = vst [vmem:[%s1958_s9 + $0x78] sm:$0xff] %v750_v17  ;;  %796 = vst [vmem:[%s1958_s9 + $0xe8] sm:$0xff] %v764_v37 }
 0x216   : > { %797 = vst [vmem:[%s1958_s9 + $0xf0] sm:$0xff] %v765_v38  ;;  %798 = vst [vmem:[%s1958_s9 + $0xf8] sm:$0xff] %v766_v39 }
 0x217 PF: > { %p2342_p2 = scmp.ne.s32.totalorder %s2326_s20, 0 }
 0x218   : > { %s2343_s19 = sld [smem:[#allocation19_spill]] (%p2342_p2)  ;;  %s2344_s25 = sld [smem:[#allocation20_spill]] (%p2342_p2)  ;;  %v824_v40 = vld [vmem:[%s1958_s9] sm:$0xff] (%p2342_p2)  ;;  %v826_v41 = vld [vmem:[%s1958_s9 + $0x8] sm:$0xff] (%p2342_p2)  ;;  %v828_v42 = vld [vmem:[%s1958_s9 + $0x10] sm:$0xff] (%p2342_p2) }
 0x219   : > { %805 = sbr.rel (!%p2342_p2) target bundleno = 562 (0x232), region = 56  ;;  %v830_v43 = vld [vmem:[%s1958_s9 + $0x18] sm:$0xff] (%p2342_p2)  ;;  %v832_v44 = vld [vmem:[%s1958_s9 + $0x20] sm:$0xff] (%p2342_p2)  ;;  %v834_v45 = vld [vmem:[%s1958_s9 + $0x28] sm:$0xff] (%p2342_p2)  ;;  %s2345_s10 = sld [smem:[#allocation29_spill]] (%p2342_p2) }
 0x21a   : > { %v836_v46 = vld [vmem:[%s1958_s9 + $0x30] sm:$0xff] (%p2342_p2)  ;;  %v838_v47 = vld [vmem:[%s1958_s9 + $0x38] sm:$0xff] (%p2342_p2)  ;;  %v840_v48 = vld [vmem:[%s1958_s9 + $0x40] sm:$0xff] (%p2342_p2) }
 0x21b   : > { %v842_v49 = vld [vmem:[%s1958_s9 + $0x48] sm:$0xff] (%p2342_p2)  ;;  %v846_v51 = vld [vmem:[%s1958_s9 + $0x58] sm:$0xff] (%p2342_p2)  ;;  %v848_v52 = vld [vmem:[%s1958_s9 + $0x60] sm:$0xff] (%p2342_p2) }
 0x21c   : > { %v850_v53 = vld [vmem:[%s1958_s9 + $0x68] sm:$0xff] (%p2342_p2)  ;;  %v852_v54 = vld [vmem:[%s1958_s9 + $0x70] sm:$0xff] (%p2342_p2)  ;;  %v854_v55 = vld [vmem:[%s1958_s9 + $0x78] sm:$0xff] (%p2342_p2) }
 0x21d   : > { %v858_v57 = vld [vmem:[%s1958_s9 + $0x88] sm:$0xff] (%p2342_p2)  ;;  %v860_v58 = vld [vmem:[%s1958_s9 + $0x90] sm:$0xff] (%p2342_p2)  ;;  %v862_v59 = vld [vmem:[%s1958_s9 + $0x98] sm:$0xff] (%p2342_p2) }
 0x21e   : > { %s1048_s23 = sshll.u32 (%p2342_p2), %s2343_s19, 1  ;;  %s1056_s7 = sshll.u32 (%p2342_p2), %s2344_s25, 7  ;;  %v844_v50 = vld [vmem:[%s1958_s9 + $0x50] sm:$0xff] (%p2342_p2)  ;;  %v856_v56 = vld [vmem:[%s1958_s9 + $0x80] sm:$0xff] (%p2342_p2)  ;;  %v866_v61 = vld [vmem:[%s1958_s9 + $0xa8] sm:$0xff] (%p2342_p2) }
 0x21f   : > { %s809_s20 = sadd.s32 (%p2342_p2), %s1056_s7, %s1048_s23  ;;  %v864_v60 = vld [vmem:[%s1958_s9 + $0xa0] sm:$0xff] (%p2342_p2)  ;;  %v868_v62 = vld [vmem:[%s1958_s9 + $0xb0] sm:$0xff] (%p2342_p2)  ;;  %v870_v63 = vld [vmem:[%s1958_s9 + $0xb8] sm:$0xff] (%p2342_p2) }
 0x220   : > { %s1050_s12 = sshll.u32 %s809_s20, 3  ;;  %v872_v0 = vld [vmem:[%s1958_s9 + $0xc0] sm:$0xff]  ;;  %v874_v1 = vld [vmem:[%s1958_s9 + $0xc8] sm:$0xff]  ;;  %v876_v2 = vld [vmem:[%s1958_s9 + $0xd0] sm:$0xff] }
 0x221   : > { %s2144_s2 = scalar_lea.vmem %s2345_s10, %s1050_s12  ;;  %v878_v3 = vld [vmem:[%s1958_s9 + $0xd8] sm:$0xff]  ;;  %v880_v4 = vld [vmem:[%s1958_s9 + $0xe0] sm:$0xff]  ;;  %v882_v5 = vld [vmem:[%s1958_s9 + $0xe8] sm:$0xff] }
 0x222   : > { %825 = vst [vmem:[%s2144_s2] sm:$0xff] %v824_v40  ;;  %827 = vst [vmem:[%s2144_s2 + $0x8] sm:$0xff] %v826_v41  ;;  %v884_v6 = vld [vmem:[%s1958_s9 + $0xf0] sm:$0xff]  ;;  %v886_v7 = vld [vmem:[%s1958_s9 + $0xf8] sm:$0xff] }
 0x223   : > { %829 = vst [vmem:[%s2144_s2 + $0x40] sm:$0xff] %v828_v42  ;;  %831 = vst [vmem:[%s2144_s2 + $0x48] sm:$0xff] %v830_v43 }
 0x224   : > { %833 = vst [vmem:[%s2144_s2 + $0x80] sm:$0xff] %v832_v44  ;;  %835 = vst [vmem:[%s2144_s2 + $0x88] sm:$0xff] %v834_v45 }
 0x225   : > { %837 = vst [vmem:[%s2144_s2 + $0xc0] sm:$0xff] %v836_v46  ;;  %839 = vst [vmem:[%s2144_s2 + $0xc8] sm:$0xff] %v838_v47 }
 0x226   : > { %841 = vst [vmem:[%s2144_s2 + $0x100] sm:$0xff] %v840_v48  ;;  %843 = vst [vmem:[%s2144_s2 + $0x108] sm:$0xff] %v842_v49 }
 0x227   : > { %845 = vst [vmem:[%s2144_s2 + $0x140] sm:$0xff] %v844_v50  ;;  %847 = vst [vmem:[%s2144_s2 + $0x148] sm:$0xff] %v846_v51 }
 0x228   : > { %849 = vst [vmem:[%s2144_s2 + $0x180] sm:$0xff] %v848_v52  ;;  %851 = vst [vmem:[%s2144_s2 + $0x188] sm:$0xff] %v850_v53 }
 0x229   : > { %853 = vst [vmem:[%s2144_s2 + $0x1c0] sm:$0xff] %v852_v54  ;;  %855 = vst [vmem:[%s2144_s2 + $0x1c8] sm:$0xff] %v854_v55 }
 0x22a   : > { %857 = vst [vmem:[%s2144_s2 + $0x200] sm:$0xff] %v856_v56  ;;  %859 = vst [vmem:[%s2144_s2 + $0x208] sm:$0xff] %v858_v57 }
 0x22b   : > { %861 = vst [vmem:[%s2144_s2 + $0x240] sm:$0xff] %v860_v58  ;;  %863 = vst [vmem:[%s2144_s2 + $0x248] sm:$0xff] %v862_v59 }
 0x22c   : > { %865 = vst [vmem:[%s2144_s2 + $0x280] sm:$0xff] %v864_v60  ;;  %867 = vst [vmem:[%s2144_s2 + $0x288] sm:$0xff] %v866_v61 }
 0x22d   : > { %869 = vst [vmem:[%s2144_s2 + $0x2c0] sm:$0xff] %v868_v62  ;;  %871 = vst [vmem:[%s2144_s2 + $0x2c8] sm:$0xff] %v870_v63 }
 0x22e   : > { %873 = vst [vmem:[%s2144_s2 + $0x300] sm:$0xff] %v872_v0  ;;  %875 = vst [vmem:[%s2144_s2 + $0x308] sm:$0xff] %v874_v1 }
 0x22f   : > { %877 = vst [vmem:[%s2144_s2 + $0x340] sm:$0xff] %v876_v2  ;;  %879 = vst [vmem:[%s2144_s2 + $0x348] sm:$0xff] %v878_v3 }
 0x230   : > { %881 = vst [vmem:[%s2144_s2 + $0x380] sm:$0xff] %v880_v4  ;;  %883 = vst [vmem:[%s2144_s2 + $0x388] sm:$0xff] %v882_v5 }
 0x231   : > { %885 = vst [vmem:[%s2144_s2 + $0x3c0] sm:$0xff] %v884_v6  ;;  %887 = vst [vmem:[%s2144_s2 + $0x3c8] sm:$0xff] %v886_v7 }
 0x232 PF: > { %s19_s29 = sadd.s32 1, %s1562_s29   ;;  %s2348_s14 = sld [smem:[#allocation14_spill]] }
 0x233   : > { %p2202_p3 = scmp.ge.s32.totalorder %s19_s29, 34   ;;  %s2349_s6 = sld [smem:[#allocation16_spill]] }
 0x234   : > { %s2350_s18 = sld [smem:[#allocation17_spill]]  ;;  %s2351_s19 = sld [smem:[#allocation24_spill]] }
 0x235   : > { %s2352_s23 = sld [smem:[#allocation21_spill]]  ;;  %s2353_s26 = sld [smem:[#allocation22_spill]] }
 0x236   : > { %s2354_s9 = sld [smem:[#allocation23_spill]]  ;;  %s2355_s12 = smov %s1498_s13 }
 0x237   : > { %s2356_s1 = smov %s2376_s17  ;;  %s2357_s13 = smov %s1809_s3 }
 0x238   : > { %s2359_s15 = smov %s1510_s16  ;;  %s2360_s16 = smov %s1864_s30 }
 0x239   : > { %s2361_s17 = smov %s2349_s6  ;;  %s2362_s20 = smov %s1530_s21 }
 0x23a   : > { %s2363_s21 = smov %s1534_s22  ;;  %s2364_s22 = smov %s1806_s11 }
 0x23b   : > { %s2365_s24 = smov %s1554_s27  ;;  %s2366_s25 = smov %s1558_s28 }
 0x23c   : > { %s2367_s27 = smov %s2354_s9  ;;  %s2368_s28 = smov %s2356_s1 }
 0x23d   :  { %18 = sbr.rel (!%p2202_p3) target bundleno = 16 (0x10), region = 127 }
 0x244   :  { %903 = vsyncpa [#allocation4], 1 }
 0x245   :  { %905 = vsyncpa [#allocation4 + $0x1], 1 }
 0x246   :  { %906 = vsyncpa [#allocation6], 1 }
 0x247   :  { %908 = vsyncpa [#allocation6 + $0x1], 1 }

</bundles_post_ra>
